<compile_context>
chip_gen: v6e
topology: v6e:2x2x1
jax: 0.10.0
libtpu: 0.0.40
codegen_flags: <defaults>
</compile_context>

<pallas_src>
import jax
import jax.numpy as jnp
from jax.experimental import pallas as pl
from jax.experimental.pallas import tpu as pltpu

DRIVER_NUM = 1000
DRIVER_SIZE = 32          # num_units
N_STEPS = 100
IN_DIM = 2                # (x, y) diffusion sample

N_STEPS_PAD = 128         # each step table padded to one full 128-wide one-hot
DRIVER_PAD = 1024         # driver table padded to 8 x 128 rows
DRV_CHUNK = 128           # one-hot chunk width for the driver gather
DEFAULT_BLOCK_B = 1024    # batch columns per grid step (multiple of 128)


def _round_up(n, m):
    return ((n + m - 1) // m) * m


def mlp_diffusion_kernel(xT_ref, t_ref, d_ref, step_tabT_ref, drv_tabT_ref,
                         w0t_ref, b0_ref, w1t_ref, b1_ref,
                         w2t_ref, b2_ref, w3t_ref, b3_ref,
                         o_ref):
    tb = xT_ref.shape[1]

    t = t_ref[...]                    # (1, TB)  i32
    d = d_ref[...]                    # (1, TB)  i32

    # ---- step-embedding gathers: one transposed one-hot, three MXU passes --
    step_ids = jax.lax.broadcasted_iota(jnp.int32, (N_STEPS_PAD, tb), 0)
    oh_t = jnp.where(step_ids == t, 1.0, 0.0).astype(jnp.float32)   # (128, TB)
    te0 = jnp.dot(step_tabT_ref[:, pl.ds(0, N_STEPS_PAD)], oh_t,
                  preferred_element_type=jnp.float32)               # (32, TB)
    te1 = jnp.dot(step_tabT_ref[:, pl.ds(N_STEPS_PAD, N_STEPS_PAD)], oh_t,
                  preferred_element_type=jnp.float32)
    te2 = jnp.dot(step_tabT_ref[:, pl.ds(2 * N_STEPS_PAD, N_STEPS_PAD)], oh_t,
                  preferred_element_type=jnp.float32)

    # ---- driver-embedding gather, chunked over the padded 1024-col table ---
    drv_ids = jax.lax.broadcasted_iota(jnp.int32, (DRV_CHUNK, tb), 0)
    de = jnp.zeros((DRIVER_SIZE, tb), jnp.float32)
    for c in range(DRIVER_PAD // DRV_CHUNK):
        # shift the (1, TB) index instead of the (128, TB) iota (cheaper VPU)
        oh_d = jnp.where(drv_ids == (d - c * DRV_CHUNK), 1.0, 0.0)
        oh_d = oh_d.astype(jnp.float32)                              # (128, TB)
        chunk = drv_tabT_ref[:, pl.ds(c * DRV_CHUNK, DRV_CHUNK)]     # (32, 128)
        de = de + jnp.dot(chunk, oh_d, preferred_element_type=jnp.float32)

    # ---- block 0: Linear(2,32) as two VPU broadcast-FMAs (skip K=2 MXU) ----
    xT = xT_ref[...]                                                 # (2, TB)
    w0t = w0t_ref[...]                                               # (32, 2)
    h = w0t[:, 0:1] * xT[0:1, :] + w0t[:, 1:2] * xT[1:2, :] + b0_ref[...]
    h = jnp.maximum(h + te0 + de, 0.0)                               # (32, TB)

    # ---- block 1: Linear(32,32) + t_emb1, ReLU ----
    h = jnp.dot(w1t_ref[...], h, preferred_element_type=jnp.float32) + b1_ref[...]
    h = jnp.maximum(h + te1, 0.0)

    # ---- block 2: Linear(32,32) + t_emb2, ReLU ----
    h = jnp.dot(w2t_ref[...], h, preferred_element_type=jnp.float32) + b2_ref[...]
    h = jnp.maximum(h + te2, 0.0)

    # ---- output head: (2, 32) @ (32, TB) -> lane-dense (2, TB) store ------
    out = jnp.dot(w3t_ref[...], h, preferred_element_type=jnp.float32) + b3_ref[...]
    o_ref[...] = out.astype(o_ref.dtype)


def mlp_diffusion_forward(x, t, d, params, *, block_b=DEFAULT_BLOCK_B):
    """x: (B, 2) f32, t: (B,) int, d: (B,) int  ->  (B, 2) f32."""
    B = x.shape[0]
    tb = min(block_b, _round_up(max(B, 1), 128))
    tb = _round_up(tb, 128)
    b_pad = _round_up(B, tb)
    grid = (b_pad // tb,)

    x_t = jnp.pad(x.astype(jnp.float32), ((0, b_pad - B), (0, 0))).T   # (2, Bp)
    t_r = jnp.pad(t.astype(jnp.int32), (0, b_pad - B)).reshape(1, b_pad)
    d_r = jnp.pad(d.astype(jnp.int32), (0, b_pad - B)).reshape(1, b_pad)

    # VMEM-resident embedding tables, transposed (padded rows are never
    # selected: one-hot of an index < N_STEPS / DRIVER_NUM is zero there).
    def _pad_rows(a, n):
        return jnp.pad(a, ((0, n - a.shape[0]), (0, 0)))

    step_tab_t = jnp.concatenate(
        [_pad_rows(params["step_emb0"], N_STEPS_PAD).T,
         _pad_rows(params["step_emb1"], N_STEPS_PAD).T,
         _pad_rows(params["step_emb2"], N_STEPS_PAD).T], axis=1)   # (32, 384)
    drv_tab_t = _pad_rows(params["driver_emb"], DRIVER_PAD).T      # (32, 1024)

    # Transposed ("math" -> column-major) weights / column biases.
    w0t, w1t, w2t, w3t = (params[k].T for k in ("w0", "w1", "w2", "w3"))
    b0c, b1c, b2c, b3c = (params[k].T for k in ("b0", "b1", "b2", "b3"))

    def batch_spec(rows):
        return pl.BlockSpec((rows, tb), lambda i: (0, i))

    def full_spec(shape):
        return pl.BlockSpec(shape, lambda i: (0, 0))

    operands = (
        x_t, t_r, d_r, step_tab_t, drv_tab_t,
        w0t, b0c, w1t, b1c, w2t, b2c, w3t, b3c,
    )
    in_specs = [
        batch_spec(IN_DIM), batch_spec(1), batch_spec(1),
        full_spec(step_tab_t.shape), full_spec(drv_tab_t.shape),
        full_spec(w0t.shape), full_spec(b0c.shape),
        full_spec(w1t.shape), full_spec(b1c.shape),
        full_spec(w2t.shape), full_spec(b2c.shape),
        full_spec(w3t.shape), full_spec(b3c.shape),
    ]

    out_t = pl.pallas_call(
        mlp_diffusion_kernel,
        out_shape=jax.ShapeDtypeStruct((IN_DIM, b_pad), jnp.float32),
        grid=grid,
        in_specs=in_specs,
        out_specs=pl.BlockSpec((IN_DIM, tb), lambda i: (0, i)),
        compiler_params=pltpu.CompilerParams(
            dimension_semantics=("parallel",)),
    )(*operands)

    return out_t[:, :B].T


def init_params(key):
    """Deterministic parameter init mirroring nn.Linear / nn.Embedding shapes."""
    ks = jax.random.split(key, 12)
    U = DRIVER_SIZE

    def linear(kw, kb, fan_in, fan_out):
        bound = 1.0 / jnp.sqrt(fan_in)
        w = jax.random.uniform(kw, (fan_in, fan_out), jnp.float32, -bound, bound)
        b = jax.random.uniform(kb, (1, fan_out), jnp.float32, -bound, bound)
        return w, b

    w0, b0 = linear(ks[0], ks[1], IN_DIM, U)
    w1, b1 = linear(ks[2], ks[3], U, U)
    w2, b2 = linear(ks[4], ks[5], U, U)
    w3, b3 = linear(ks[6], ks[7], U, IN_DIM)

    return {
        "w0": w0, "b0": b0,
        "w1": w1, "b1": b1,
        "w2": w2, "b2": b2,
        "w3": w3, "b3": b3,
        "step_emb0": jax.random.normal(ks[8], (N_STEPS, U), jnp.float32),
        "step_emb1": jax.random.normal(ks[9], (N_STEPS, U), jnp.float32),
        "step_emb2": jax.random.normal(ks[10], (N_STEPS, U), jnp.float32),
        "driver_emb": jax.random.normal(ks[11], (DRIVER_NUM, U), jnp.float32),
    }


def reference_forward(x, t, d, p):
    """Pure-JAX reference matching the PyTorch forward exactly."""
    h = x @ p["w0"] + p["b0"]
    h = h + p["step_emb0"][t]
    h = h + p["driver_emb"][d]
    h = jnp.maximum(h, 0.0)
    h = h @ p["w1"] + p["b1"]
    h = h + p["step_emb1"][t]
    h = jnp.maximum(h, 0.0)
    h = h @ p["w2"] + p["b2"]
    h = h + p["step_emb2"][t]
    h = jnp.maximum(h, 0.0)
    return h @ p["w3"] + p["b3"]


if __name__ == "__main__":
    key = jax.random.PRNGKey(0)
    kp, kx, kt, kd = jax.random.split(key, 4)

    params = init_params(kp)

    # Primary small-shape check (single grid step, B padded 8 -> 128).
    B = 8
    x = jax.random.normal(kx, (B, IN_DIM), jnp.float32)
    t = jax.random.randint(kt, (B,), 0, N_STEPS, jnp.int32)
    d = jax.random.randint(kd, (B,), 0, DRIVER_NUM, jnp.int32)

    out = jax.block_until_ready(mlp_diffusion_forward(x, t, d, params))
    ref = reference_forward(x, t, d, params)
    assert out.shape == (B, IN_DIM)
    # Loose tolerance: in-kernel matmuls ride the MXU (bf16 multi-pass f32)
    # while the reference runs in full f32; logic bugs would give O(1) error.
    assert jnp.allclose(out, ref, atol=5e-2, rtol=5e-2), "mismatch vs reference (B=8)"

    # Second check exercising batch padding + a multi-step ("parallel") grid.
    B2 = 300
    kx2, kt2, kd2 = jax.random.split(jax.random.PRNGKey(1), 3)
    x2 = jax.random.normal(kx2, (B2, IN_DIM), jnp.float32)
    t2 = jax.random.randint(kt2, (B2,), 0, N_STEPS, jnp.int32)
    d2 = jax.random.randint(kd2, (B2,), 0, DRIVER_NUM, jnp.int32)
    out2 = jax.block_until_ready(
        mlp_diffusion_forward(x2, t2, d2, params, block_b=128))
    ref2 = reference_forward(x2, t2, d2, params)
    assert out2.shape == (B2, IN_DIM)
    assert jnp.allclose(out2, ref2, atol=5e-2, rtol=5e-2), "mismatch vs reference (B=300)"

    print("KERNEL_OK")
</pallas_src>

<mosaic_0001>
module attributes {stable_mosaic.version = 11 : i64} {
  func.func @mlp_diffusion_kernel(%arg0: i32, %arg1: memref<2x128xf32, #tpu.memory_space<vmem>>, %arg2: memref<1x128xi32, #tpu.memory_space<vmem>>, %arg3: memref<1x128xi32, #tpu.memory_space<vmem>>, %arg4: memref<32x384xf32, #tpu.memory_space<vmem>>, %arg5: memref<32x1024xf32, #tpu.memory_space<vmem>>, %arg6: memref<32x2xf32, #tpu.memory_space<vmem>>, %arg7: memref<32x1xf32, #tpu.memory_space<vmem>>, %arg8: memref<32x32xf32, #tpu.memory_space<vmem>>, %arg9: memref<32x1xf32, #tpu.memory_space<vmem>>, %arg10: memref<32x32xf32, #tpu.memory_space<vmem>>, %arg11: memref<32x1xf32, #tpu.memory_space<vmem>>, %arg12: memref<2x32xf32, #tpu.memory_space<vmem>>, %arg13: memref<2x1xf32, #tpu.memory_space<vmem>>, %arg14: memref<2x128xf32, #tpu.memory_space<vmem>>) attributes {dimension_semantics = [#tpu.dimension_semantics<parallel>], iteration_bounds = array<i64: 1>, scalar_prefetch = 0 : i64, scratch_operands = 0 : i64, tpu.core_type = #tpu.core_type<tc>, window_params = [{transform_indices = @transform_0, window_bounds = array<i64: 2, 128>}, {transform_indices = @transform_1, window_bounds = array<i64: 1, 128>}, {transform_indices = @transform_2, window_bounds = array<i64: 1, 128>}, {pipeline_mode = #tpu.pipeline_mode<synchronous>, transform_indices = @transform_3, window_bounds = array<i64: 32, 384>}, {pipeline_mode = #tpu.pipeline_mode<synchronous>, transform_indices = @transform_4, window_bounds = array<i64: 32, 1024>}, {pipeline_mode = #tpu.pipeline_mode<synchronous>, transform_indices = @transform_5, window_bounds = array<i64: 32, 2>}, {pipeline_mode = #tpu.pipeline_mode<synchronous>, transform_indices = @transform_6, window_bounds = array<i64: 32, 1>}, {pipeline_mode = #tpu.pipeline_mode<synchronous>, transform_indices = @transform_7, window_bounds = array<i64: 32, 32>}, {pipeline_mode = #tpu.pipeline_mode<synchronous>, transform_indices = @transform_8, window_bounds = array<i64: 32, 1>}, {pipeline_mode = #tpu.pipeline_mode<synchronous>, transform_indices = @transform_9, window_bounds = array<i64: 32, 32>}, {pipeline_mode = #tpu.pipeline_mode<synchronous>, transform_indices = @transform_10, window_bounds = array<i64: 32, 1>}, {pipeline_mode = #tpu.pipeline_mode<synchronous>, transform_indices = @transform_11, window_bounds = array<i64: 2, 32>}, {pipeline_mode = #tpu.pipeline_mode<synchronous>, transform_indices = @transform_12, window_bounds = array<i64: 2, 1>}, {transform_indices = @transform_13, window_bounds = array<i64: 2, 128>}]} {
    %c0 = arith.constant 0 : index
    %c0_0 = arith.constant 0 : index
    %0 = vector.load %arg2[%c0, %c0_0] : memref<1x128xi32, #tpu.memory_space<vmem>>, vector<1x128xi32>
    %c0_1 = arith.constant 0 : index
    %c0_2 = arith.constant 0 : index
    %1 = vector.load %arg3[%c0_1, %c0_2] : memref<1x128xi32, #tpu.memory_space<vmem>>, vector<1x128xi32>
    %2 = tpu.iota {dimensions = array<i32: 0>} : vector<128x128xi32>
    %3 = vector.broadcast %0 : vector<1x128xi32> to vector<128x128xi32>
    %4 = arith.cmpi eq, %2, %3 : vector<128x128xi32>
    %cst = arith.constant 1.000000e+00 : f32
    %cst_3 = arith.constant 0.000000e+00 : f32
    %5 = vector.broadcast %cst : f32 to vector<128x128xf32>
    %6 = vector.broadcast %cst_3 : f32 to vector<128x128xf32>
    %7 = arith.select %4, %5, %6 : vector<128x128xi1>, vector<128x128xf32>
    %c0_4 = arith.constant 0 : index
    %c0_5 = arith.constant 0 : index
    %8 = vector.load %arg4[%c0_4, %c0_5] : memref<32x384xf32, #tpu.memory_space<vmem>>, vector<32x128xf32>
    %cst_6 = arith.constant dense<0.000000e+00> : vector<32x128xf32>
    %9 = tpu.matmul %8, %7, %cst_6 {dimension_numbers = #tpu.dot_dimension_numbers<[1], [0], [0], [1], [0, 0, 1, 1], [], []>} : vector<32x128xf32>, vector<128x128xf32>, vector<32x128xf32> -> vector<32x128xf32>
    %c0_7 = arith.constant 0 : index
    %c128 = arith.constant 128 : index
    %10 = vector.load %arg4[%c0_7, %c128] : memref<32x384xf32, #tpu.memory_space<vmem>>, vector<32x128xf32>
    %cst_8 = arith.constant dense<0.000000e+00> : vector<32x128xf32>
    %11 = tpu.matmul %10, %7, %cst_8 {dimension_numbers = #tpu.dot_dimension_numbers<[1], [0], [0], [1], [0, 0, 1, 1], [], []>} : vector<32x128xf32>, vector<128x128xf32>, vector<32x128xf32> -> vector<32x128xf32>
    %c0_9 = arith.constant 0 : index
    %c256 = arith.constant 256 : index
    %12 = vector.load %arg4[%c0_9, %c256] : memref<32x384xf32, #tpu.memory_space<vmem>>, vector<32x128xf32>
    %cst_10 = arith.constant dense<0.000000e+00> : vector<32x128xf32>
    %13 = tpu.matmul %12, %7, %cst_10 {dimension_numbers = #tpu.dot_dimension_numbers<[1], [0], [0], [1], [0, 0, 1, 1], [], []>} : vector<32x128xf32>, vector<128x128xf32>, vector<32x128xf32> -> vector<32x128xf32>
    %14 = tpu.iota {dimensions = array<i32: 0>} : vector<128x128xi32>
    %cst_11 = arith.constant 0.000000e+00 : f32
    %15 = vector.broadcast %cst_11 : f32 to vector<32x128xf32>
    %c0_i32 = arith.constant 0 : i32
    %16 = vector.broadcast %c0_i32 : i32 to vector<1x128xi32>
    %17 = arith.subi %1, %16 : vector<1x128xi32>
    %18 = vector.broadcast %17 : vector<1x128xi32> to vector<128x128xi32>
    %19 = arith.cmpi eq, %14, %18 : vector<128x128xi32>
    %cst_12 = arith.constant 1.000000e+00 : f32
    %cst_13 = arith.constant 0.000000e+00 : f32
    %20 = vector.broadcast %cst_12 : f32 to vector<128x128xf32>
    %21 = vector.broadcast %cst_13 : f32 to vector<128x128xf32>
    %22 = arith.select %19, %20, %21 : vector<128x128xi1>, vector<128x128xf32>
    %c0_14 = arith.constant 0 : index
    %c0_15 = arith.constant 0 : index
    %23 = vector.load %arg5[%c0_14, %c0_15] : memref<32x1024xf32, #tpu.memory_space<vmem>>, vector<32x128xf32>
    %cst_16 = arith.constant dense<0.000000e+00> : vector<32x128xf32>
    %24 = tpu.matmul %23, %22, %cst_16 {dimension_numbers = #tpu.dot_dimension_numbers<[1], [0], [0], [1], [0, 0, 1, 1], [], []>} : vector<32x128xf32>, vector<128x128xf32>, vector<32x128xf32> -> vector<32x128xf32>
    %25 = arith.addf %15, %24 : vector<32x128xf32>
    %c128_i32 = arith.constant 128 : i32
    %26 = vector.broadcast %c128_i32 : i32 to vector<1x128xi32>
    %27 = arith.subi %1, %26 : vector<1x128xi32>
    %28 = vector.broadcast %27 : vector<1x128xi32> to vector<128x128xi32>
    %29 = arith.cmpi eq, %14, %28 : vector<128x128xi32>
    %cst_17 = arith.constant 1.000000e+00 : f32
    %cst_18 = arith.constant 0.000000e+00 : f32
    %30 = vector.broadcast %cst_17 : f32 to vector<128x128xf32>
    %31 = vector.broadcast %cst_18 : f32 to vector<128x128xf32>
    %32 = arith.select %29, %30, %31 : vector<128x128xi1>, vector<128x128xf32>
    %c0_19 = arith.constant 0 : index
    %c128_20 = arith.constant 128 : index
    %33 = vector.load %arg5[%c0_19, %c128_20] : memref<32x1024xf32, #tpu.memory_space<vmem>>, vector<32x128xf32>
    %cst_21 = arith.constant dense<0.000000e+00> : vector<32x128xf32>
    %34 = tpu.matmul %33, %32, %cst_21 {dimension_numbers = #tpu.dot_dimension_numbers<[1], [0], [0], [1], [0, 0, 1, 1], [], []>} : vector<32x128xf32>, vector<128x128xf32>, vector<32x128xf32> -> vector<32x128xf32>
    %35 = arith.addf %25, %34 : vector<32x128xf32>
    %c256_i32 = arith.constant 256 : i32
    %36 = vector.broadcast %c256_i32 : i32 to vector<1x128xi32>
    %37 = arith.subi %1, %36 : vector<1x128xi32>
    %38 = vector.broadcast %37 : vector<1x128xi32> to vector<128x128xi32>
    %39 = arith.cmpi eq, %14, %38 : vector<128x128xi32>
    %cst_22 = arith.constant 1.000000e+00 : f32
    %cst_23 = arith.constant 0.000000e+00 : f32
    %40 = vector.broadcast %cst_22 : f32 to vector<128x128xf32>
    %41 = vector.broadcast %cst_23 : f32 to vector<128x128xf32>
    %42 = arith.select %39, %40, %41 : vector<128x128xi1>, vector<128x128xf32>
    %c0_24 = arith.constant 0 : index
    %c256_25 = arith.constant 256 : index
    %43 = vector.load %arg5[%c0_24, %c256_25] : memref<32x1024xf32, #tpu.memory_space<vmem>>, vector<32x128xf32>
    %cst_26 = arith.constant dense<0.000000e+00> : vector<32x128xf32>
    %44 = tpu.matmul %43, %42, %cst_26 {dimension_numbers = #tpu.dot_dimension_numbers<[1], [0], [0], [1], [0, 0, 1, 1], [], []>} : vector<32x128xf32>, vector<128x128xf32>, vector<32x128xf32> -> vector<32x128xf32>
    %45 = arith.addf %35, %44 : vector<32x128xf32>
    %c384_i32 = arith.constant 384 : i32
    %46 = vector.broadcast %c384_i32 : i32 to vector<1x128xi32>
    %47 = arith.subi %1, %46 : vector<1x128xi32>
    %48 = vector.broadcast %47 : vector<1x128xi32> to vector<128x128xi32>
    %49 = arith.cmpi eq, %14, %48 : vector<128x128xi32>
    %cst_27 = arith.constant 1.000000e+00 : f32
    %cst_28 = arith.constant 0.000000e+00 : f32
    %50 = vector.broadcast %cst_27 : f32 to vector<128x128xf32>
    %51 = vector.broadcast %cst_28 : f32 to vector<128x128xf32>
    %52 = arith.select %49, %50, %51 : vector<128x128xi1>, vector<128x128xf32>
    %c0_29 = arith.constant 0 : index
    %c384 = arith.constant 384 : index
    %53 = vector.load %arg5[%c0_29, %c384] : memref<32x1024xf32, #tpu.memory_space<vmem>>, vector<32x128xf32>
    %cst_30 = arith.constant dense<0.000000e+00> : vector<32x128xf32>
    %54 = tpu.matmul %53, %52, %cst_30 {dimension_numbers = #tpu.dot_dimension_numbers<[1], [0], [0], [1], [0, 0, 1, 1], [], []>} : vector<32x128xf32>, vector<128x128xf32>, vector<32x128xf32> -> vector<32x128xf32>
    %55 = arith.addf %45, %54 : vector<32x128xf32>
    %c512_i32 = arith.constant 512 : i32
    %56 = vector.broadcast %c512_i32 : i32 to vector<1x128xi32>
    %57 = arith.subi %1, %56 : vector<1x128xi32>
    %58 = vector.broadcast %57 : vector<1x128xi32> to vector<128x128xi32>
    %59 = arith.cmpi eq, %14, %58 : vector<128x128xi32>
    %cst_31 = arith.constant 1.000000e+00 : f32
    %cst_32 = arith.constant 0.000000e+00 : f32
    %60 = vector.broadcast %cst_31 : f32 to vector<128x128xf32>
    %61 = vector.broadcast %cst_32 : f32 to vector<128x128xf32>
    %62 = arith.select %59, %60, %61 : vector<128x128xi1>, vector<128x128xf32>
    %c0_33 = arith.constant 0 : index
    %c512 = arith.constant 512 : index
    %63 = vector.load %arg5[%c0_33, %c512] : memref<32x1024xf32, #tpu.memory_space<vmem>>, vector<32x128xf32>
    %cst_34 = arith.constant dense<0.000000e+00> : vector<32x128xf32>
    %64 = tpu.matmul %63, %62, %cst_34 {dimension_numbers = #tpu.dot_dimension_numbers<[1], [0], [0], [1], [0, 0, 1, 1], [], []>} : vector<32x128xf32>, vector<128x128xf32>, vector<32x128xf32> -> vector<32x128xf32>
    %65 = arith.addf %55, %64 : vector<32x128xf32>
    %c640_i32 = arith.constant 640 : i32
    %66 = vector.broadcast %c640_i32 : i32 to vector<1x128xi32>
    %67 = arith.subi %1, %66 : vector<1x128xi32>
    %68 = vector.broadcast %67 : vector<1x128xi32> to vector<128x128xi32>
    %69 = arith.cmpi eq, %14, %68 : vector<128x128xi32>
    %cst_35 = arith.constant 1.000000e+00 : f32
    %cst_36 = arith.constant 0.000000e+00 : f32
    %70 = vector.broadcast %cst_35 : f32 to vector<128x128xf32>
    %71 = vector.broadcast %cst_36 : f32 to vector<128x128xf32>
    %72 = arith.select %69, %70, %71 : vector<128x128xi1>, vector<128x128xf32>
    %c0_37 = arith.constant 0 : index
    %c640 = arith.constant 640 : index
    %73 = vector.load %arg5[%c0_37, %c640] : memref<32x1024xf32, #tpu.memory_space<vmem>>, vector<32x128xf32>
    %cst_38 = arith.constant dense<0.000000e+00> : vector<32x128xf32>
    %74 = tpu.matmul %73, %72, %cst_38 {dimension_numbers = #tpu.dot_dimension_numbers<[1], [0], [0], [1], [0, 0, 1, 1], [], []>} : vector<32x128xf32>, vector<128x128xf32>, vector<32x128xf32> -> vector<32x128xf32>
    %75 = arith.addf %65, %74 : vector<32x128xf32>
    %c768_i32 = arith.constant 768 : i32
    %76 = vector.broadcast %c768_i32 : i32 to vector<1x128xi32>
    %77 = arith.subi %1, %76 : vector<1x128xi32>
    %78 = vector.broadcast %77 : vector<1x128xi32> to vector<128x128xi32>
    %79 = arith.cmpi eq, %14, %78 : vector<128x128xi32>
    %cst_39 = arith.constant 1.000000e+00 : f32
    %cst_40 = arith.constant 0.000000e+00 : f32
    %80 = vector.broadcast %cst_39 : f32 to vector<128x128xf32>
    %81 = vector.broadcast %cst_40 : f32 to vector<128x128xf32>
    %82 = arith.select %79, %80, %81 : vector<128x128xi1>, vector<128x128xf32>
    %c0_41 = arith.constant 0 : index
    %c768 = arith.constant 768 : index
    %83 = vector.load %arg5[%c0_41, %c768] : memref<32x1024xf32, #tpu.memory_space<vmem>>, vector<32x128xf32>
    %cst_42 = arith.constant dense<0.000000e+00> : vector<32x128xf32>
    %84 = tpu.matmul %83, %82, %cst_42 {dimension_numbers = #tpu.dot_dimension_numbers<[1], [0], [0], [1], [0, 0, 1, 1], [], []>} : vector<32x128xf32>, vector<128x128xf32>, vector<32x128xf32> -> vector<32x128xf32>
    %85 = arith.addf %75, %84 : vector<32x128xf32>
    %c896_i32 = arith.constant 896 : i32
    %86 = vector.broadcast %c896_i32 : i32 to vector<1x128xi32>
    %87 = arith.subi %1, %86 : vector<1x128xi32>
    %88 = vector.broadcast %87 : vector<1x128xi32> to vector<128x128xi32>
    %89 = arith.cmpi eq, %14, %88 : vector<128x128xi32>
    %cst_43 = arith.constant 1.000000e+00 : f32
    %cst_44 = arith.constant 0.000000e+00 : f32
    %90 = vector.broadcast %cst_43 : f32 to vector<128x128xf32>
    %91 = vector.broadcast %cst_44 : f32 to vector<128x128xf32>
    %92 = arith.select %89, %90, %91 : vector<128x128xi1>, vector<128x128xf32>
    %c0_45 = arith.constant 0 : index
    %c896 = arith.constant 896 : index
    %93 = vector.load %arg5[%c0_45, %c896] : memref<32x1024xf32, #tpu.memory_space<vmem>>, vector<32x128xf32>
    %cst_46 = arith.constant dense<0.000000e+00> : vector<32x128xf32>
    %94 = tpu.matmul %93, %92, %cst_46 {dimension_numbers = #tpu.dot_dimension_numbers<[1], [0], [0], [1], [0, 0, 1, 1], [], []>} : vector<32x128xf32>, vector<128x128xf32>, vector<32x128xf32> -> vector<32x128xf32>
    %95 = arith.addf %85, %94 : vector<32x128xf32>
    %c0_47 = arith.constant 0 : index
    %c0_48 = arith.constant 0 : index
    %96 = vector.load %arg1[%c0_47, %c0_48] : memref<2x128xf32, #tpu.memory_space<vmem>>, vector<2x128xf32>
    %c0_49 = arith.constant 0 : index
    %c0_50 = arith.constant 0 : index
    %97 = vector.load %arg6[%c0_49, %c0_50] : memref<32x2xf32, #tpu.memory_space<vmem>>, vector<32x2xf32>
    %98 = vector.extract_strided_slice %97 {offsets = [0, 0], sizes = [32, 1], strides = [1, 1]} : vector<32x2xf32> to vector<32x1xf32>
    %99 = vector.extract_strided_slice %96 {offsets = [0, 0], sizes = [1, 128], strides = [1, 1]} : vector<2x128xf32> to vector<1x128xf32>
    %100 = vector.broadcast %98 : vector<32x1xf32> to vector<32x128xf32>
    %101 = vector.broadcast %99 : vector<1x128xf32> to vector<32x128xf32>
    %102 = arith.mulf %100, %101 : vector<32x128xf32>
    %103 = vector.extract_strided_slice %97 {offsets = [0, 1], sizes = [32, 1], strides = [1, 1]} : vector<32x2xf32> to vector<32x1xf32>
    %104 = vector.extract_strided_slice %96 {offsets = [1, 0], sizes = [1, 128], strides = [1, 1]} : vector<2x128xf32> to vector<1x128xf32>
    %105 = vector.broadcast %103 : vector<32x1xf32> to vector<32x128xf32>
    %106 = vector.broadcast %104 : vector<1x128xf32> to vector<32x128xf32>
    %107 = arith.mulf %105, %106 : vector<32x128xf32>
    %108 = arith.addf %102, %107 : vector<32x128xf32>
    %c0_51 = arith.constant 0 : index
    %c0_52 = arith.constant 0 : index
    %109 = vector.load %arg7[%c0_51, %c0_52] : memref<32x1xf32, #tpu.memory_space<vmem>>, vector<32x1xf32>
    %110 = vector.broadcast %109 : vector<32x1xf32> to vector<32x128xf32>
    %111 = arith.addf %108, %110 : vector<32x128xf32>
    %112 = arith.addf %111, %9 : vector<32x128xf32>
    %113 = arith.addf %112, %95 : vector<32x128xf32>
    %cst_53 = arith.constant 0.000000e+00 : f32
    %114 = vector.broadcast %cst_53 : f32 to vector<32x128xf32>
    %115 = arith.maximumf %113, %114 : vector<32x128xf32>
    %c0_54 = arith.constant 0 : index
    %c0_55 = arith.constant 0 : index
    %116 = vector.load %arg8[%c0_54, %c0_55] : memref<32x32xf32, #tpu.memory_space<vmem>>, vector<32x32xf32>
    %cst_56 = arith.constant dense<0.000000e+00> : vector<32x128xf32>
    %117 = tpu.matmul %116, %115, %cst_56 {dimension_numbers = #tpu.dot_dimension_numbers<[1], [0], [0], [1], [0, 0, 1, 1], [], []>} : vector<32x32xf32>, vector<32x128xf32>, vector<32x128xf32> -> vector<32x128xf32>
    %c0_57 = arith.constant 0 : index
    %c0_58 = arith.constant 0 : index
    %118 = vector.load %arg9[%c0_57, %c0_58] : memref<32x1xf32, #tpu.memory_space<vmem>>, vector<32x1xf32>
    %119 = vector.broadcast %118 : vector<32x1xf32> to vector<32x128xf32>
    %120 = arith.addf %117, %119 : vector<32x128xf32>
    %121 = arith.addf %120, %11 : vector<32x128xf32>
    %cst_59 = arith.constant 0.000000e+00 : f32
    %122 = vector.broadcast %cst_59 : f32 to vector<32x128xf32>
    %123 = arith.maximumf %121, %122 : vector<32x128xf32>
    %c0_60 = arith.constant 0 : index
    %c0_61 = arith.constant 0 : index
    %124 = vector.load %arg10[%c0_60, %c0_61] : memref<32x32xf32, #tpu.memory_space<vmem>>, vector<32x32xf32>
    %cst_62 = arith.constant dense<0.000000e+00> : vector<32x128xf32>
    %125 = tpu.matmul %124, %123, %cst_62 {dimension_numbers = #tpu.dot_dimension_numbers<[1], [0], [0], [1], [0, 0, 1, 1], [], []>} : vector<32x32xf32>, vector<32x128xf32>, vector<32x128xf32> -> vector<32x128xf32>
    %c0_63 = arith.constant 0 : index
    %c0_64 = arith.constant 0 : index
    %126 = vector.load %arg11[%c0_63, %c0_64] : memref<32x1xf32, #tpu.memory_space<vmem>>, vector<32x1xf32>
    %127 = vector.broadcast %126 : vector<32x1xf32> to vector<32x128xf32>
    %128 = arith.addf %125, %127 : vector<32x128xf32>
    %129 = arith.addf %128, %13 : vector<32x128xf32>
    %cst_65 = arith.constant 0.000000e+00 : f32
    %130 = vector.broadcast %cst_65 : f32 to vector<32x128xf32>
    %131 = arith.maximumf %129, %130 : vector<32x128xf32>
    %c0_66 = arith.constant 0 : index
    %c0_67 = arith.constant 0 : index
    %132 = vector.load %arg12[%c0_66, %c0_67] : memref<2x32xf32, #tpu.memory_space<vmem>>, vector<2x32xf32>
    %cst_68 = arith.constant dense<0.000000e+00> : vector<2x128xf32>
    %133 = tpu.matmul %132, %131, %cst_68 {dimension_numbers = #tpu.dot_dimension_numbers<[1], [0], [0], [1], [0, 0, 1, 1], [], []>} : vector<2x32xf32>, vector<32x128xf32>, vector<2x128xf32> -> vector<2x128xf32>
    %c0_69 = arith.constant 0 : index
    %c0_70 = arith.constant 0 : index
    %134 = vector.load %arg13[%c0_69, %c0_70] : memref<2x1xf32, #tpu.memory_space<vmem>>, vector<2x1xf32>
    %135 = vector.broadcast %134 : vector<2x1xf32> to vector<2x128xf32>
    %136 = arith.addf %133, %135 : vector<2x128xf32>
    %c0_71 = arith.constant 0 : index
    %c0_72 = arith.constant 0 : index
    %137 = vector.load %arg14[%c0_71, %c0_72] : memref<2x128xf32, #tpu.memory_space<vmem>>, vector<2x128xf32>
    tpu.vector_store %arg14[%c0_71, %c0_72], %136 {strides = array<i32>} : memref<2x128xf32, #tpu.memory_space<vmem>>, vector<2x128xf32>,
    return
  }
  func.func @transform_0(%arg0: i32) -> (i32, i32) {
    %c0_i32 = arith.constant 0 : i32
    %c0_i32_0 = arith.constant 0 : i32
    return %c0_i32, %arg0 : i32, i32
  }
  func.func @transform_1(%arg0: i32) -> (i32, i32) {
    %c0_i32 = arith.constant 0 : i32
    %c0_i32_0 = arith.constant 0 : i32
    return %c0_i32, %arg0 : i32, i32
  }
  func.func @transform_2(%arg0: i32) -> (i32, i32) {
    %c0_i32 = arith.constant 0 : i32
    %c0_i32_0 = arith.constant 0 : i32
    return %c0_i32, %arg0 : i32, i32
  }
  func.func @transform_3(%arg0: i32) -> (i32, i32) {
    %c0_i32 = arith.constant 0 : i32
    %c0_i32_0 = arith.constant 0 : i32
    %c0_i32_1 = arith.constant 0 : i32
    return %c0_i32, %c0_i32_0 : i32, i32
  }
  func.func @transform_4(%arg0: i32) -> (i32, i32) {
    %c0_i32 = arith.constant 0 : i32
    %c0_i32_0 = arith.constant 0 : i32
    %c0_i32_1 = arith.constant 0 : i32
    return %c0_i32, %c0_i32_0 : i32, i32
  }
  func.func @transform_5(%arg0: i32) -> (i32, i32) {
    %c0_i32 = arith.constant 0 : i32
    %c0_i32_0 = arith.constant 0 : i32
    %c0_i32_1 = arith.constant 0 : i32
    return %c0_i32, %c0_i32_0 : i32, i32
  }
  func.func @transform_6(%arg0: i32) -> (i32, i32) {
    %c0_i32 = arith.constant 0 : i32
    %c0_i32_0 = arith.constant 0 : i32
    %c0_i32_1 = arith.constant 0 : i32
    return %c0_i32, %c0_i32_0 : i32, i32
  }
  func.func @transform_7(%arg0: i32) -> (i32, i32) {
    %c0_i32 = arith.constant 0 : i32
    %c0_i32_0 = arith.constant 0 : i32
    %c0_i32_1 = arith.constant 0 : i32
    return %c0_i32, %c0_i32_0 : i32, i32
  }
  func.func @transform_8(%arg0: i32) -> (i32, i32) {
    %c0_i32 = arith.constant 0 : i32
    %c0_i32_0 = arith.constant 0 : i32
    %c0_i32_1 = arith.constant 0 : i32
    return %c0_i32, %c0_i32_0 : i32, i32
  }
  func.func @transform_9(%arg0: i32) -> (i32, i32) {
    %c0_i32 = arith.constant 0 : i32
    %c0_i32_0 = arith.constant 0 : i32
    %c0_i32_1 = arith.constant 0 : i32
    return %c0_i32, %c0_i32_0 : i32, i32
  }
  func.func @transform_10(%arg0: i32) -> (i32, i32) {
    %c0_i32 = arith.constant 0 : i32
    %c0_i32_0 = arith.constant 0 : i32
    %c0_i32_1 = arith.constant 0 : i32
    return %c0_i32, %c0_i32_0 : i32, i32
  }
  func.func @transform_11(%arg0: i32) -> (i32, i32) {
    %c0_i32 = arith.constant 0 : i32
    %c0_i32_0 = arith.constant 0 : i32
    %c0_i32_1 = arith.constant 0 : i32
    return %c0_i32, %c0_i32_0 : i32, i32
  }
  func.func @transform_12(%arg0: i32) -> (i32, i32) {
    %c0_i32 = arith.constant 0 : i32
    %c0_i32_0 = arith.constant 0 : i32
    %c0_i32_1 = arith.constant 0 : i32
    return %c0_i32, %c0_i32_0 : i32, i32
  }
  func.func @transform_13(%arg0: i32) -> (i32, i32) {
    %c0_i32 = arith.constant 0 : i32
    %c0_i32_0 = arith.constant 0 : i32
    return %c0_i32, %arg0 : i32, i32
  }
}

</mosaic_0001>

<bundles_post_ra>
// kernel: tpu_custom_call.1
= control target key start
LH: loop header
LB: loop body
LE: loop exit
PB: predicated region body
PF: predicated region fallthrough
CT: control target
= control target key end

     0   :  { %18 = vsyncpa [#allocation3], 0  ;;  %s4285_s0 = inlined_call_operand.vmem [shape: f32[2,128], index: 0, kind: input, shape index: {}]   ;;  %s4286_s1 = inlined_call_operand.vmem [shape: s32[1,128], index: 1, kind: input, shape index: {}]   ;;  %s4287_s2 = inlined_call_operand.vmem [shape: s32[1,128], index: 2, kind: input, shape index: {}]   ;;  %s4288_s3 = inlined_call_operand.vmem [shape: f32[32,384], index: 3, kind: input, shape index: {}]   ;;  %s4289_s4 = inlined_call_operand.hbm [shape: f32[32,1024], index: 4, kind: input, shape index: {}]   ;;  %s4290_s5 = inlined_call_operand.vmem [shape: f32[32,2], index: 5, kind: input, shape index: {}]   ;;  %s4291_s6 = inlined_call_operand.vmem [shape: f32[32,1], index: 6, kind: input, shape index: {}]   ;;  %s4292_s7 = inlined_call_operand.vmem [shape: f32[32,32], index: 7, kind: input, shape index: {}]   ;;  %s4293_s8 = inlined_call_operand.vmem [shape: f32[32,1], index: 8, kind: input, shape index: {}]   ;;  %s4294_s9 = inlined_call_operand.hbm [shape: f32[32,32], index: 9, kind: input, shape index: {}]   ;;  %s4295_s10 = inlined_call_operand.vmem [shape: f32[32,1], index: 10, kind: input, shape index: {}]   ;;  %s4296_s11 = inlined_call_operand.vmem [shape: f32[2,32], index: 11, kind: input, shape index: {}]   ;;  %s4297_s12 = inlined_call_operand.vmem [shape: f32[2,1], index: 12, kind: input, shape index: {}]   ;;  %s4298_s13 = inlined_call_operand.hbm [shape: f32[2,128], index: 13, kind: output, shape index: {}]  }
   0x1   :  { %19 = vsyncpa [#allocation6], 0 }
   0x2   :  { %20 = vsyncpa [#allocation4], 0  ;;  %s2867_s25 = smov [#allocation2]  }
   0x3   :  { %s34_s26 = sshll.u32 %s2867_s25, 4  ;;  %s35_s26 = int_to_ptr.vmem [resolvable:$true] %s34_s26 }
   0x4   :  { %s2809_s27 = scalar_lea.vmem %s35_s26, 4096  ;;  %p2814_p1 = scmp.lt.s32.totalorder %s35_s26, %s35_s26 }
   0x5   :  { %p2810_p0 = scmp.ne.s32.totalorder %s35_s26, %s2809_s27  ;;  %p2815_p2 = scmp.lt.s32.totalorder %s2809_s27, %s2809_s27 }
   0x7   :  { %p2816_p3 = por %p2815_p2, %p2814_p1 }
   0x9   :  { %p2817_p4 = pnand %p2816_p3, %p2810_p0 }
   0xb   :  { %2820 = shalt.err (!%p2817_p4)
}
   0xc   :  { %s2868_s28 = smov 1024   ;;  %s2869_s29 = smov 64  }
   0xd   :  { %40 = dma.hbm_to_vmem [thread:$0]  %s4289_s4, 4096, %s35_s26, [#allocation3], %s2868_s28, %s2868_s28, %s2869_s29  }
   0xe   :  { %s2870_s15 = smov [#allocation5]  }
   0xf   :  { %s54_s16 = sshll.u32 %s2870_s15, 4  ;;  %s55_s16 = int_to_ptr.vmem [resolvable:$true] %s54_s16 }
  0x10   :  { %s2829_s17 = scalar_lea.vmem %s55_s16, 512  ;;  %p2834_p6 = scmp.lt.s32.totalorder %s55_s16, %s55_s16 }
  0x11   :  { %p2830_p5 = scmp.ne.s32.totalorder %s55_s16, %s2829_s17  ;;  %p2835_p7 = scmp.lt.s32.totalorder %s2829_s17, %s2829_s17 }
  0x13   :  { %p2836_p8 = por %p2835_p7, %p2834_p6 }
  0x15   :  { %p2837_p9 = pnand %p2836_p8, %p2830_p5 }
  0x17   :  { %2840 = shalt.err (!%p2837_p9)
}
  0x18   :  { %s2871_s18 = smov 128   ;;  %s2872_s19 = smov 8  }
  0x19   :  { %60 = dma.hbm_to_vmem [thread:$0]  %s4294_s9, 512, %s55_s16, [#allocation6], %s2871_s18, %s2871_s18, %s2872_s19  }
  0x1a   :  { %2861 = dma.done.wait [#allocation3], 4096  }
  0x1b   :  { %2862 = vsyncadd [#allocation3], 4294963200 }
  0x1c   :  { %2863 = dma.done.wait [#allocation6], 512  }
  0x1d   :  { %2864 = vsyncadd [#allocation6], 4294966784  ;;  %v75_v0 = vlaneseq  ;;  %v2873_v1 = vmov 0   ;;  %v2874_v2 = vmov 1   ;;  %v2971_v7 = vld [vmem:[%s4286_s1] ss:$0 sm:$0xff] }
  0x1e   :  { %2795 = vset.pattern.permute.xlu1 %v2873_v1  ;;  %2794 = vset.pattern.permute.xlu0 %v2874_v2  ;;  %v128_v8 = vld [vmem:[%s4288_s3] sm:$0xff]  ;;  %v2875_v12 = vmov 1.0   ;;  %v4328_v32 = vmov 0  ;;  %v4330_v37 = vmov 0  ;;  %v4336_v43 = vmov 0  ;;  %v129_v46 = vld [vmem:[%s4288_s3 + $0x18] sm:$0xff] }
  0x1f   :  { %v2957_v3 = vshrl.u32 %v75_v0, 7  ;;  %2357 = vmatprep.mubr.f32.mxu0 %v128_v8  ;;  %v3141_v27 = vld [vmem:[%s4287_s2] sm:$0x1]  ;;  %v4338_v44 = vmov 0  ;;  %v217_v49 = vld [vmem:[%s4288_s3 + $0x8] sm:$0xff]  ;;  %v130_v55 = vld [vmem:[%s4288_s3 + $0x30] sm:$0xff] }
  0x20   :  { %v1990_v28 = vadd.s32 4294966912, %v3141_v27  ;;  %v2007_v36 = vadd.s32 4294966784, %v3141_v27  ;;  %v1940_v42 = vadd.s32 4294967168, %v3141_v27  ;;  %v2024_v47 = vadd.s32 4294966656, %v3141_v27  ;;  %v218_v50 = vld [vmem:[%s4288_s3 + $0x20] sm:$0xff]  ;;  %2395 = vmatprep.mubr.f32.mxu1 %v217_v49  ;;  %v131_v56 = vld [vmem:[%s4288_s3 + $0x48] sm:$0xff] }
  0x21   :  { %v2960_v4 = vadd.s32 120, %v2957_v3  ;;  %v2963_v5 = vadd.s32 112, %v2957_v3  ;;  %v2966_v6 = vadd.s32 104, %v2957_v3  ;;  %v2989_v11 = vadd.s32 96, %v2957_v3  ;;  %v219_v58 = vld [vmem:[%s4288_s3 + $0x38] sm:$0xff]  ;;  %v220_v60 = vld [vmem:[%s4288_s3 + $0x50] sm:$0xff] }
  0x22   :  { %v3010_v14 = vadd.s32 88, %v2957_v3  ;;  %v3031_v16 = vadd.s32 80, %v2957_v3  ;;  %v3052_v18 = vadd.s32 72, %v2957_v3  ;;  %v3073_v20 = vadd.s32 64, %v2957_v3  ;;  %v306_v61 = vld [vmem:[%s4288_s3 + $0x10] sm:$0xff]  ;;  %v307_v63 = vld [vmem:[%s4288_s3 + $0x28] sm:$0xff] }
  0x23   :  { %vm2978_vm0 = vcmp.eq.s32.totalorder %v2960_v4, %v2971_v7  ;;  %vm2984_vm1 = vcmp.eq.s32.totalorder %v2963_v5, %v2971_v7  ;;  %vm3005_vm2 = vcmp.eq.s32.totalorder %v2966_v6, %v2971_v7  ;;  %vm3026_vm3 = vcmp.eq.s32.totalorder %v2989_v11, %v2971_v7  ;;  %v472_v0 = vld [vmem:[#allocation2 + $0x8] sm:$0xff]  ;;  %v1429_v8 = vld [vmem:[%s4290_s5 + $0x10] sm:$0xff]  ;;  %v1430_v9 = vld [vmem:[%s4290_s5 + $0x18] sm:$0xff]  ;;  %s2878_s4 = smov [#allocation7]  }
  0x24   :  { %2325 = vmatprep.subr.msk.mxu0 %vm2978_vm0, %v2875_v12  ;;  %2363 = vmatprep.subr.msk.mxu1 %vm2978_vm0, %v2875_v12  ;;  %vm3047_vm4 = vcmp.eq.s32.totalorder %v3010_v14, %v2971_v7  ;;  %vm3068_vm5 = vcmp.eq.s32.totalorder %v3031_v16, %v2971_v7  ;;  %vm3089_vm6 = vcmp.eq.s32.totalorder %v3052_v18, %v2971_v7  ;;  %v3094_v22 = vadd.s32 56, %v2957_v3  ;;  %v1428_v10 = vld [vmem:[%s4290_s5 + $0x8] sm:$0xff]  ;;  %v1490_v13 = vld [vmem:[%s4291_s6 + $0x18] sm:$0xff]  ;;  %v308_v15 = vld [vmem:[%s4288_s3 + $0x40] sm:$0xff]  ;;  %s1881_s9 = sshll.u32 %s2878_s4, 4  ;;  %s1882_s9 = int_to_ptr.vmem [resolvable:$true] %s1881_s9 }
  0x25   :  { %2326 = vmatpush3.msk.msra.mxu0 %vm2978_vm0, %v2875_v12  ;;  %2364 = vmatpush3.msk.msra.mxu1 %vm2978_vm0, %v2875_v12  ;;  %vm3110_vm7 = vcmp.eq.s32.totalorder %v3073_v20, %v2971_v7  ;;  %v3115_v24 = vadd.s32 48, %v2957_v3  ;;  %v3136_v26 = vadd.s32 40, %v2957_v3  ;;  %v3163_v30 = vadd.s32 32, %v2957_v3  ;;  %v309_v17 = vld [vmem:[%s4288_s3 + $0x58] sm:$0xff]  ;;  %v1427_v19 = vld [vmem:[%s4290_s5] sm:$0xff]  ;;  %v474_v21 = vld [vmem:[#allocation2 + $0x88] sm:$0xff]  ;;  %p2846_p11 = scmp.lt.s32.totalorder %s1882_s9, %s1882_s9 }
  0x26   :  { %2327 = vmatprep.subr.msk.mxu0 %vm2984_vm1, %v2875_v12  ;;  %2365 = vmatprep.subr.msk.mxu1 %vm2984_vm1, %v2875_v12  ;;  %vm3131_vm8 = vcmp.eq.s32.totalorder %v3094_v22, %v2971_v7  ;;  %v3172_v31 = vsub.s32 0, %v2957_v3  ;;  %v3187_v33 = vadd.s32 24, %v2957_v3  ;;  %v3190_v34 = vadd.s32 16, %v2957_v3  ;;  %v431_v23 = vld [vmem:[#allocation2] sm:$0xff]  ;;  %v684_v29 = vld [vmem:[#allocation2 + $0x50] sm:$0xff]  ;;  %v1074_v49 = vld [vmem:[#allocation2 + $0x68] sm:$0xff] }
  0x27   :  { %2328 = vmatpush3.msk.msra.mxu0 %vm2984_vm1, %v2875_v12  ;;  %2366 = vmatpush3.msk.msra.mxu1 %vm2984_vm1, %v2875_v12  ;;  %vm3158_vm9 = vcmp.eq.s32.totalorder %v3115_v24, %v2971_v7  ;;  %vm3182_vm10 = vcmp.eq.s32.totalorder %v3136_v26, %v2971_v7  ;;  %vm3210_vm11 = vcmp.eq.s32.totalorder %v3163_v30, %v2971_v7  ;;  %v3239_v40 = vadd.s32 8, %v2957_v3  ;;  %v432_v25 = vld [vmem:[#allocation2 + $0x40] sm:$0xff]  ;;  %v685_v38 = vld [vmem:[#allocation2 + $0x90] sm:$0xff]  ;;  %s2841_s22 = scalar_lea.vmem %s1882_s9, 32 }
  0x28   :  { %2329 = vmatprep.subr.msk.mxu0 %vm3005_vm2, %v2875_v12  ;;  %2367 = vmatprep.subr.msk.mxu1 %vm3005_vm2, %v2875_v12  ;;  %v4329_v32 = vsel %vm3182_vm10, 4294967295, %v4328_v32  ;;  %v3199_v35 = vrot.slane %v1990_v28, %v3172_v31  ;;  %v4331_v37 = vsel %vm3210_vm11, 4294967295, %v4330_v37  ;;  %vm3228_vm12 = vcmp.eq.s32.totalorder %v3187_v33, %v2971_v7  ;;  %v683_v28 = vld [vmem:[#allocation2 + $0x10] sm:$0xff]  ;;  %p2842_p10 = scmp.ne.s32.totalorder %s1882_s9, %s2841_s22  ;;  %p2847_p12 = scmp.lt.s32.totalorder %s2841_s22, %s2841_s22 }
  0x29   :  { %2330 = vmatpush3.msk.msra.mxu0 %vm3005_vm2, %v2875_v12  ;;  %2368 = vmatpush3.msk.msra.mxu1 %vm3005_vm2, %v2875_v12  ;;  %vm3234_vm13 = vcmp.eq.s32.totalorder %v3190_v34, %v2971_v7  ;;  %v3252_v41 = vrot.slane %v2007_v36, %v3172_v31  ;;  %vm3287_vm15 = vcmp.eq.s32.totalorder %v3239_v40, %v2971_v7  ;;  %v2041_v48 = vadd.s32 4294966528, %v3141_v27  ;;  %v433_v36 = vld [vmem:[#allocation2 + $0x80] sm:$0xff]  ;;  %v686_v39 = vld [vmem:[#allocation2 + $0xd0] sm:$0xff] }
  0x2a   :  { %2331 = vmatprep.subr.msk.mxu0 %vm3026_vm3, %v2875_v12  ;;  %2369 = vmatprep.subr.msk.mxu1 %vm3026_vm3, %v2875_v12  ;;  %v4337_v43 = vsel %vm3287_vm15, 4294967295, %v4336_v43  ;;  %v3314_v45 = vrot.slane %v1940_v42, %v3172_v31  ;;  %v3360_v51 = vrot.slane %v2024_v47, %v3172_v31  ;;  %v2058_v53 = vadd.s32 4294966400, %v3141_v27  ;;  %v813_v42 = vld [vmem:[#allocation2 + $0x18] sm:$0xff]  ;;  %v946_v47 = vld [vmem:[#allocation2 + $0xe0] sm:$0xff]  ;;  %p2848_p13 = por %p2847_p12, %p2846_p11 }
  0x2b   :  { %2332 = vmatpush3.msk.msra.mxu0 %vm3026_vm3, %v2875_v12  ;;  %2370 = vmatpush3.msk.msra.mxu1 %vm3026_vm3, %v2875_v12  ;;  %v3363_v52 = vrot.slane %v2041_v48, %v3172_v31  ;;  %v1973_v57 = vadd.s32 4294967040, %v3141_v27  ;;  %v3558_v59 = vrot.slane %v3141_v27, %v3172_v31  ;;  %v1489_v27 = vld [vmem:[%s4291_s6 + $0x10] sm:$0xff]  ;;  %v1073_v48 = vld [vmem:[#allocation2 + $0x28] sm:$0xff] }
  0x2c   :  { %2333 = vmatprep.subr.msk.mxu0 %vm3047_vm4, %v2875_v12  ;;  %2371 = vmatprep.subr.msk.mxu1 %vm3047_vm4, %v2875_v12  ;;  %vm4307_vm14 = vcmp.eq.s32.totalorder %v2960_v4, %v3314_v45  ;;  %v3504_v54 = vrot.slane %v2058_v53, %v3172_v31  ;;  %v1075_v53 = vld [vmem:[#allocation2 + $0xa8] sm:$0xff]  ;;  %p2849_p0 = pnand %p2848_p13, %p2842_p10 }
  0x2d   :  { %2334 = vmatpush3.msk.msra.mxu0 %vm3047_vm4, %v2875_v12  ;;  %2372 = vmatpush3.msk.msra.mxu1 %vm3047_vm4, %v2875_v12  ;;  %v3576_v62 = vrot.slane %v1973_v57, %v3172_v31  ;;  %v1333_v57 = vld [vmem:[#allocation2 + $0x38] sm:$0xff] }
  0x2e   :  { %2335 = vmatprep.subr.msk.mxu0 %vm3068_vm5, %v2875_v12  ;;  %2373 = vmatprep.subr.msk.mxu1 %vm3068_vm5, %v2875_v12 }
  0x2f   :  { %2336 = vmatpush3.msk.msra.mxu0 %vm3068_vm5, %v2875_v12  ;;  %2374 = vmatpush3.msk.msra.mxu1 %vm3068_vm5, %v2875_v12 }
  0x30   :  { %2337 = vmatprep.subr.msk.mxu0 %vm3089_vm6, %v2875_v12  ;;  %2375 = vmatprep.subr.msk.mxu1 %vm3089_vm6, %v2875_v12 }
  0x31   :  { %2338 = vmatpush3.msk.msra.mxu0 %vm3089_vm6, %v2875_v12  ;;  %2376 = vmatpush3.msk.msra.mxu1 %vm3089_vm6, %v2875_v12 }
  0x32   :  { %2339 = vmatprep.subr.msk.mxu0 %vm3110_vm7, %v2875_v12  ;;  %2377 = vmatprep.subr.msk.mxu1 %vm3110_vm7, %v2875_v12 }
  0x33   :  { %2340 = vmatpush3.msk.msra.mxu0 %vm3110_vm7, %v2875_v12  ;;  %2378 = vmatpush3.msk.msra.mxu1 %vm3110_vm7, %v2875_v12 }
  0x34   :  { %2341 = vmatprep.subr.msk.mxu0 %vm3131_vm8, %v2875_v12  ;;  %2379 = vmatprep.subr.msk.mxu1 %vm3131_vm8, %v2875_v12 }
  0x35   :  { %2342 = vmatpush3.msk.msra.mxu0 %vm3131_vm8, %v2875_v12  ;;  %2380 = vmatpush3.msk.msra.mxu1 %vm3131_vm8, %v2875_v12 }
  0x36   :  { %2343 = vmatprep.subr.msk.mxu0 %vm3158_vm9, %v2875_v12  ;;  %2381 = vmatprep.subr.msk.mxu1 %vm3158_vm9, %v2875_v12 }
  0x37   :  { %2344 = vmatpush3.msk.msra.mxu0 %vm3158_vm9, %v2875_v12  ;;  %2382 = vmatpush3.msk.msra.mxu1 %vm3158_vm9, %v2875_v12 }
  0x38   :  { %2345 = vmatprep.subr.msk.mxu0 %vm3182_vm10, %v2875_v12  ;;  %2383 = vmatprep.subr.msk.mxu1 %vm3182_vm10, %v2875_v12 }
  0x39   :  { %2346 = vmatpush3.msk.msra.mxu0 %vm3182_vm10, %v2875_v12  ;;  %2384 = vmatpush3.msk.msra.mxu1 %vm3182_vm10, %v2875_v12  ;;  %vm3309_vm10 = vcmp.eq.s32.totalorder %v2957_v3, %v2971_v7  ;;  %v473_v7 = vld [vmem:[#allocation2 + $0x48] sm:$0xff] }
  0x3a   :  { %2347 = vmatprep.subr.msk.mxu0 %vm3210_vm11, %v2875_v12  ;;  %2385 = vmatprep.subr.msk.mxu1 %vm3210_vm11, %v2875_v12  ;;  %v4339_v44 = vsel %vm3309_vm10, 4294967295, %v4338_v44 }
  0x3b   :  { %2348 = vmatpush3.msk.msra.mxu0 %vm3210_vm11, %v2875_v12  ;;  %2386 = vmatpush3.msk.msra.mxu1 %vm3210_vm11, %v2875_v12  ;;  %vm4340_vm11 = vcmp.eq.s32.totalorder %v2960_v4, %v3314_v45 }
  0x3c   :  { %2349 = vmatprep.subr.msk.mxu0 %vm3228_vm12, %v2875_v12  ;;  %2387 = vmatprep.subr.msk.mxu1 %vm3228_vm12, %v2875_v12 }
  0x3d   :  { %2350 = vmatpush3.msk.msra.mxu0 %vm3228_vm12, %v2875_v12  ;;  %2388 = vmatpush3.msk.msra.mxu1 %vm3228_vm12, %v2875_v12 }
  0x3e   :  { %2351 = vmatprep.subr.msk.mxu0 %vm3234_vm13, %v2875_v12  ;;  %2389 = vmatprep.subr.msk.mxu1 %vm3234_vm13, %v2875_v12 }
  0x3f   :  { %2352 = vmatpush3.msk.msra.mxu0 %vm3234_vm13, %v2875_v12  ;;  %2390 = vmatpush3.msk.msra.mxu1 %vm3234_vm13, %v2875_v12 }
  0x40   :  { %2353 = vmatprep.subr.msk.mxu0 %vm3287_vm15, %v2875_v12  ;;  %2391 = vmatprep.subr.msk.mxu1 %vm3287_vm15, %v2875_v12 }
  0x41   :  { %2354 = vmatpush3.msk.msra.mxu0 %vm3287_vm15, %v2875_v12  ;;  %2392 = vmatpush3.msk.msra.mxu1 %vm3287_vm15, %v2875_v12 }
  0x42   :  { %2355 = vmatprep.subr.msk.mxu0 %vm3309_vm10, %v2875_v12  ;;  %2393 = vmatprep.subr.msk.mxu1 %vm3309_vm10, %v2875_v12 }
  0x43   :  { %2356 = vmatpush3.msk.msra.mxu0 %vm3309_vm10, %v2875_v12  ;;  %2394 = vmatpush3.msk.msra.mxu1 %vm3309_vm10, %v2875_v12  ;;  %vm1183_vm10 = vcmp.eq.s32.totalorder %v2989_v11, %v3363_v52 }
  0x44   :  { %2358 = vmatmul.mubr.f32.vlgmr.msra.gmra.mxu0 %v129_v46  ;;  %2401 = vmatprep.subr.msk.mxu0 %vm2978_vm0, %v2875_v12  ;;  %v945_v46 = vld [vmem:[#allocation2 + $0xa0] sm:$0xff] }
  0x45   :  { %2402 = vmatpush3.msk.msra.mxu0 %vm2978_vm0, %v2875_v12  ;;  %2439 = vmatprep.subr.msk.mxu1 %vm4307_vm14, %v2875_v12  ;;  %vm453_vm0 = vcmp.eq.s32.totalorder %v2966_v6, %v3314_v45  ;;  %vm4341_vm14 = vcmp.eq.s32.totalorder %v2963_v5, %v3314_v45 }
  0x46   :  { %2403 = vmatprep.subr.msk.mxu0 %vm2984_vm1, %v2875_v12  ;;  %2396 = vmatmul.mubr.f32.vlgmr.msra.gmra.mxu1 %v218_v50  ;;  %vm4342_vm15 = vmmov %vm4341_vm14  ;;  %v1203_v50 = vld [vmem:[#allocation2 + $0x30] sm:$0xff] }
  0x47   :  { %2404 = vmatpush3.msk.msra.mxu0 %vm2984_vm1, %v2875_v12  ;;  %2440 = vmatpush3.msk.msra.mxu1 %vm4340_vm11, %v2875_v12  ;;  %vm1184_vm11 = vcmp.eq.s32.totalorder %v2966_v6, %v3363_v52  ;;  %vm1052_vm1 = vcmp.eq.s32.totalorder %v3010_v14, %v3360_v51 }
  0x48   :  { %2405 = vmatprep.subr.msk.mxu0 %vm3005_vm2, %v2875_v12  ;;  %2441 = vmatprep.subr.msk.mxu1 %vm4341_vm14, %v2875_v12  ;;  %vm1182_vm14 = vcmp.eq.s32.totalorder %v3010_v14, %v3363_v52 }
  0x49   :  { %2406 = vmatpush3.msk.msra.mxu0 %vm3005_vm2, %v2875_v12  ;;  %2442 = vmatpush3.msk.msra.mxu1 %vm4342_vm15, %v2875_v12  ;;  %vm452_vm2 = vcmp.eq.s32.totalorder %v2989_v11, %v3314_v45  ;;  %vm451_vm15 = vcmp.eq.s32.totalorder %v3010_v14, %v3314_v45 }
  0x4a   :  { %2407 = vmatprep.subr.msk.mxu0 %vm3026_vm3, %v2875_v12  ;;  %2443 = vmatprep.subr.msk.mxu1 %vm453_vm0, %v2875_v12 }
  0x4b   :  { %2408 = vmatpush3.msk.msra.mxu0 %vm3026_vm3, %v2875_v12  ;;  %2444 = vmatpush3.msk.msra.mxu1 %vm453_vm0, %v2875_v12  ;;  %vm450_vm3 = vcmp.eq.s32.totalorder %v3031_v16, %v3314_v45  ;;  %vm445_vm0 = vcmp.eq.s32.totalorder %v3136_v26, %v3314_v45 }
  0x4c   :  { %2409 = vmatprep.subr.msk.mxu0 %vm3047_vm4, %v2875_v12  ;;  %2445 = vmatprep.subr.msk.mxu1 %vm452_vm2, %v2875_v12 }
  0x4d   :  { %2410 = vmatpush3.msk.msra.mxu0 %vm3047_vm4, %v2875_v12  ;;  %2446 = vmatpush3.msk.msra.mxu1 %vm452_vm2, %v2875_v12  ;;  %vm449_vm4 = vcmp.eq.s32.totalorder %v3052_v18, %v3314_v45  ;;  %vm444_vm2 = vcmp.eq.s32.totalorder %v3163_v30, %v3314_v45 }
  0x4e   :  { %2411 = vmatprep.subr.msk.mxu0 %vm3068_vm5, %v2875_v12  ;;  %2447 = vmatprep.subr.msk.mxu1 %vm451_vm15, %v2875_v12 }
  0x4f   :  { %2412 = vmatpush3.msk.msra.mxu0 %vm3068_vm5, %v2875_v12  ;;  %2448 = vmatpush3.msk.msra.mxu1 %vm451_vm15, %v2875_v12  ;;  %vm448_vm5 = vcmp.eq.s32.totalorder %v3073_v20, %v3314_v45  ;;  %vm1316_vm15 = vcmp.eq.s32.totalorder %v2960_v4, %v3504_v54 }
  0x50   :  { %2413 = vmatprep.subr.msk.mxu0 %vm3089_vm6, %v2875_v12  ;;  %2449 = vmatprep.subr.msk.mxu1 %vm450_vm3, %v2875_v12 }
  0x51   :  { %2414 = vmatpush3.msk.msra.mxu0 %vm3089_vm6, %v2875_v12  ;;  %2450 = vmatpush3.msk.msra.mxu1 %vm450_vm3, %v2875_v12  ;;  %vm447_vm6 = vcmp.eq.s32.totalorder %v3094_v22, %v3314_v45  ;;  %vm443_vm3 = vcmp.eq.s32.totalorder %v3187_v33, %v3314_v45 }
  0x52   :  { %2415 = vmatprep.subr.msk.mxu0 %vm3110_vm7, %v2875_v12  ;;  %2451 = vmatprep.subr.msk.mxu1 %vm449_vm4, %v2875_v12 }
  0x53   :  { %2416 = vmatpush3.msk.msra.mxu0 %vm3110_vm7, %v2875_v12  ;;  %2452 = vmatpush3.msk.msra.mxu1 %vm449_vm4, %v2875_v12  ;;  %vm446_vm7 = vcmp.eq.s32.totalorder %v3115_v24, %v3314_v45  ;;  %vm442_vm4 = vcmp.eq.s32.totalorder %v3190_v34, %v3314_v45 }
  0x54   :  { %2417 = vmatprep.subr.msk.mxu0 %vm3131_vm8, %v2875_v12  ;;  %2453 = vmatprep.subr.msk.mxu1 %vm448_vm5, %v2875_v12 }
  0x55   :  { %2418 = vmatpush3.msk.msra.mxu0 %vm3131_vm8, %v2875_v12  ;;  %2454 = vmatpush3.msk.msra.mxu1 %vm448_vm5, %v2875_v12  ;;  %vm4343_vm8 = vnez %v4329_v32  ;;  %vm1315_vm5 = vcmp.eq.s32.totalorder %v2963_v5, %v3504_v54  ;;  %v1487_v32 = vld [vmem:[%s4291_s6] sm:$0xff] }
  0x56   :  { %2419 = vmatprep.subr.msk.mxu0 %vm3158_vm9, %v2875_v12  ;;  %2455 = vmatprep.subr.msk.mxu1 %vm447_vm6, %v2875_v12 }
  0x57   :  { %2420 = vmatpush3.msk.msra.mxu0 %vm3158_vm9, %v2875_v12  ;;  %2456 = vmatpush3.msk.msra.mxu1 %vm447_vm6, %v2875_v12  ;;  %vm4344_vm9 = vnez %v4331_v37  ;;  %vm441_vm6 = vcmp.eq.s32.totalorder %v3239_v40, %v3314_v45  ;;  %v434_v37 = vld [vmem:[#allocation2 + $0xc0] sm:$0xff] }
  0x58   :  { %2421 = vmatprep.subr.msk.mxu0 %vm4343_vm8, %v2875_v12  ;;  %2457 = vmatprep.subr.msk.mxu1 %vm446_vm7, %v2875_v12 }
  0x59   :  { %2422 = vmatpush3.msk.msra.mxu0 %vm4343_vm8, %v2875_v12  ;;  %2458 = vmatpush3.msk.msra.mxu1 %vm446_vm7, %v2875_v12  ;;  %vm4345_vm7 = vnez %v4337_v43  ;;  %vm4346_vm8 = vnez %v4339_v44  ;;  %v814_v43 = vld [vmem:[#allocation2 + $0x58] sm:$0xff]  ;;  %v944_v44 = vld [vmem:[#allocation2 + $0x60] sm:$0xff] }
  0x5a   :  { %2423 = vmatprep.subr.msk.mxu0 %vm4344_vm9, %v2875_v12  ;;  %2459 = vmatprep.subr.msk.mxu1 %vm445_vm0, %v2875_v12 }
  0x5b   :  { %2424 = vmatpush3.msk.msra.mxu0 %vm4344_vm9, %v2875_v12  ;;  %2460 = vmatpush3.msk.msra.mxu1 %vm445_vm0, %v2875_v12  ;;  %vm440_vm0 = vcmp.eq.s32.totalorder %v2957_v3, %v3314_v45  ;;  %vm1312_vm9 = vcmp.eq.s32.totalorder %v3010_v14, %v3504_v54  ;;  %v815_v45 = vld [vmem:[#allocation2 + $0x98] sm:$0xff] }
  0x5c   :  { %2425 = vmatprep.subr.msk.mxu0 %vm3228_vm12, %v2875_v12  ;;  %2461 = vmatprep.subr.msk.mxu1 %vm444_vm2, %v2875_v12 }
  0x5d   :  { %2426 = vmatpush3.msk.msra.mxu0 %vm3228_vm12, %v2875_v12  ;;  %2462 = vmatpush3.msk.msra.mxu1 %vm444_vm2, %v2875_v12  ;;  %vm1314_vm12 = vcmp.eq.s32.totalorder %v2966_v6, %v3504_v54  ;;  %vm414_vm2 = vcmp.eq.s32.totalorder %v2960_v4, %v3558_v59 }
  0x5e   :  { %2360 = vmatprep.mubr.f32.mxu0 %v130_v55  ;;  %2427 = vmatprep.subr.msk.mxu0 %vm3234_vm13, %v2875_v12  ;;  %v1076_v55 = vld [vmem:[#allocation2 + $0xe8] sm:$0xff] }
  0x5f   :  { %2463 = vmatprep.subr.msk.mxu1 %vm443_vm3, %v2875_v12  ;;  %2361 = vmatmul.mubr.f32.gmra.mxu0 %v131_v56  ;;  %v1206_v56 = vld [vmem:[#allocation2 + $0xf0] sm:$0xff] }
  0x60   :  { %2464 = vmatpush3.msk.msra.mxu1 %vm443_vm3, %v2875_v12  ;;  %2428 = vmatpush3.msk.msra.mxu0 %vm3234_vm13, %v2875_v12  ;;  %vm1313_vm13 = vcmp.eq.s32.totalorder %v2989_v11, %v3504_v54  ;;  %vm413_vm3 = vcmp.eq.s32.totalorder %v2963_v5, %v3558_v59 }
  0x61   :  { %2465 = vmatprep.subr.msk.mxu1 %vm442_vm4, %v2875_v12  ;;  %2429 = vmatprep.subr.msk.mxu0 %vm4345_vm7, %v2875_v12 }
  0x62   :  { %2466 = vmatpush3.msk.msra.mxu1 %vm442_vm4, %v2875_v12  ;;  %2430 = vmatpush3.msk.msra.mxu0 %vm4345_vm7, %v2875_v12  ;;  %vm666_vm4 = vcmp.eq.s32.totalorder %v2960_v4, %v3576_v62  ;;  %vm665_vm7 = vcmp.eq.s32.totalorder %v2963_v5, %v3576_v62 }
  0x63   :  { %2398 = vmatprep.mubr.f32.mxu1 %v219_v58  ;;  %2431 = vmatprep.subr.msk.mxu0 %vm4346_vm8, %v2875_v12 }
  0x64   :  { %2467 = vmatprep.subr.msk.mxu1 %vm441_vm6, %v2875_v12  ;;  %2399 = vmatmul.mubr.f32.gmra.mxu1 %v220_v60 }
  0x65   :  { %2432 = vmatpush3.msk.msra.mxu0 %vm4346_vm8, %v2875_v12  ;;  %2433 = vmatprep.mubr.f32.mxu0 %v306_v61  ;;  %vm411_vm8 = vcmp.eq.s32.totalorder %v2989_v11, %v3558_v59 }
  0x66   :  { %2468 = vmatpush3.msk.msra.mxu1 %vm441_vm6, %v2875_v12  ;;  %2434 = vmatmul.mubr.f32.vlgmr.msra.gmra.mxu0 %v307_v63  ;;  %vm412_vm6 = vcmp.eq.s32.totalorder %v2966_v6, %v3558_v59 }
  0x67   :  { %2469 = vmatprep.subr.msk.mxu1 %vm440_vm0, %v2875_v12  ;;  %2477 = vmatprep.subr.msk.mxu0 %vm414_vm2, %v2875_v12 }
  0x68   :  { %2470 = vmatpush3.msk.msra.mxu1 %vm440_vm0, %v2875_v12  ;;  %2478 = vmatpush3.msk.msra.mxu0 %vm414_vm2, %v2875_v12  ;;  %vm664_vm0 = vcmp.eq.s32.totalorder %v2966_v6, %v3576_v62  ;;  %vm410_vm2 = vcmp.eq.s32.totalorder %v3010_v14, %v3558_v59 }
  0x69   :  { %2471 = vmatprep.mubr.f32.mxu1 %v472_v0  ;;  %2479 = vmatprep.subr.msk.mxu0 %vm413_vm3, %v2875_v12 }
  0x6a   :  { %2515 = vmatprep.subr.msk.mxu1 %vm666_vm4, %v2875_v12  ;;  %2472 = vmatmul.mubr.f32.vlgmr.msra.gmra.mxu1 %v473_v7 }
  0x6b   :  { %2480 = vmatpush3.msk.msra.mxu0 %vm413_vm3, %v2875_v12  ;;  %2516 = vmatpush3.msk.msra.mxu1 %vm666_vm4, %v2875_v12  ;;  %vm663_vm3 = vcmp.eq.s32.totalorder %v2989_v11, %v3576_v62  ;;  %vm409_vm4 = vcmp.eq.s32.totalorder %v3031_v16, %v3558_v59 }
  0x6c   :  { %2481 = vmatprep.subr.msk.mxu0 %vm412_vm6, %v2875_v12  ;;  %2517 = vmatprep.subr.msk.mxu1 %vm665_vm7, %v2875_v12 }
  0x6d   :  { %2482 = vmatpush3.msk.msra.mxu0 %vm412_vm6, %v2875_v12  ;;  %2518 = vmatpush3.msk.msra.mxu1 %vm665_vm7, %v2875_v12  ;;  %vm662_vm6 = vcmp.eq.s32.totalorder %v3010_v14, %v3576_v62  ;;  %vm408_vm7 = vcmp.eq.s32.totalorder %v3052_v18, %v3558_v59 }
  0x6e   :  { %2483 = vmatprep.subr.msk.mxu0 %vm411_vm8, %v2875_v12  ;;  %2519 = vmatprep.subr.msk.mxu1 %vm664_vm0, %v2875_v12 }
  0x6f   :  { %2484 = vmatpush3.msk.msra.mxu0 %vm411_vm8, %v2875_v12  ;;  %2520 = vmatpush3.msk.msra.mxu1 %vm664_vm0, %v2875_v12  ;;  %vm661_vm8 = vcmp.eq.s32.totalorder %v3031_v16, %v3576_v62  ;;  %vm407_vm0 = vcmp.eq.s32.totalorder %v3073_v20, %v3558_v59 }
  0x70   :  { %2485 = vmatprep.subr.msk.mxu0 %vm410_vm2, %v2875_v12  ;;  %2521 = vmatprep.subr.msk.mxu1 %vm663_vm3, %v2875_v12 }
  0x71   :  { %1443 = vperm.xlu1 %2795, %v1429_v8   ;;  %2486 = vmatpush3.msk.msra.mxu0 %vm410_vm2, %v2875_v12  ;;  %vm660_vm2 = vcmp.eq.s32.totalorder %v3052_v18, %v3576_v62 }
  0x72   :  { %2522 = vmatpush3.msk.msra.mxu1 %vm663_vm3, %v2875_v12  ;;  %2487 = vmatprep.subr.msk.mxu0 %vm409_vm4, %v2875_v12  ;;  %vm406_vm3 = vcmp.eq.s32.totalorder %v3094_v22, %v3558_v59 }
  0x73   :  { %2523 = vmatprep.subr.msk.mxu1 %vm662_vm6, %v2875_v12  ;;  %2488 = vmatpush3.msk.msra.mxu0 %vm409_vm4, %v2875_v12  ;;  %vm659_vm4 = vcmp.eq.s32.totalorder %v3073_v20, %v3576_v62 }
  0x74   :  { %2524 = vmatpush3.msk.msra.mxu1 %vm662_vm6, %v2875_v12  ;;  %2489 = vmatprep.subr.msk.mxu0 %vm408_vm7, %v2875_v12  ;;  %vm405_vm6 = vcmp.eq.s32.totalorder %v3115_v24, %v3558_v59 }
  0x75   :  { %2525 = vmatprep.subr.msk.mxu1 %vm661_vm8, %v2875_v12  ;;  %2796 = vset.pattern.permute.xlu1 %v2874_v2 }
  0x76   :  { %2490 = vmatpush3.msk.msra.mxu0 %vm408_vm7, %v2875_v12  ;;  %2526 = vmatpush3.msk.msra.mxu1 %vm661_vm8, %v2875_v12  ;;  %vm658_vm7 = vcmp.eq.s32.totalorder %v3094_v22, %v3576_v62  ;;  %vm404_vm8 = vcmp.eq.s32.totalorder %v3136_v26, %v3558_v59 }
  0x77   :  { %1468 = vperm.xlu1 %2796, %v1429_v8   ;;  %2491 = vmatprep.subr.msk.mxu0 %vm407_vm0, %v2875_v12 }
  0x78   :  { %2527 = vmatprep.subr.msk.mxu1 %vm660_vm2, %v2875_v12  ;;  %2492 = vmatpush3.msk.msra.mxu0 %vm407_vm0, %v2875_v12  ;;  %vm657_vm0 = vcmp.eq.s32.totalorder %v3115_v24, %v3576_v62 }
  0x79   :  { %2528 = vmatpush3.msk.msra.mxu1 %vm660_vm2, %v2875_v12  ;;  %2493 = vmatprep.subr.msk.mxu0 %vm406_vm3, %v2875_v12  ;;  %vm403_vm2 = vcmp.eq.s32.totalorder %v3163_v30, %v3558_v59 }
  0x7a   :  { %2529 = vmatprep.subr.msk.mxu1 %vm659_vm4, %v2875_v12  ;;  %2494 = vmatpush3.msk.msra.mxu0 %vm406_vm3, %v2875_v12  ;;  %vm656_vm3 = vcmp.eq.s32.totalorder %v3136_v26, %v3576_v62 }
  0x7b   :  { %2530 = vmatpush3.msk.msra.mxu1 %vm659_vm4, %v2875_v12  ;;  %2797 = vset.pattern.permute.xlu1 %v2873_v1  ;;  %vm402_vm4 = vcmp.eq.s32.totalorder %v3187_v33, %v3558_v59 }
  0x7c   :  { %2495 = vmatprep.subr.msk.mxu0 %vm405_vm6, %v2875_v12  ;;  %2531 = vmatprep.subr.msk.mxu1 %vm658_vm7, %v2875_v12 }
  0x7d   :  { %1472 = vperm.xlu0 %2794, %v1430_v9   ;;  %1438 = vperm.xlu1 %2797, %v1428_v10  }
  0x7e   :  { %2496 = vmatpush3.msk.msra.mxu0 %vm405_vm6, %v2875_v12  ;;  %2532 = vmatpush3.msk.msra.mxu1 %vm658_vm7, %v2875_v12  ;;  %vm655_vm6 = vcmp.eq.s32.totalorder %v3163_v30, %v3576_v62  ;;  %vm401_vm7 = vcmp.eq.s32.totalorder %v3190_v34, %v3558_v59 }
  0x7f   :  { %2497 = vmatprep.subr.msk.mxu0 %vm404_vm8, %v2875_v12  ;;  %2533 = vmatprep.subr.msk.mxu1 %vm657_vm0, %v2875_v12 }
  0x80   :  { %2498 = vmatpush3.msk.msra.mxu0 %vm404_vm8, %v2875_v12  ;;  %2534 = vmatpush3.msk.msra.mxu1 %vm657_vm0, %v2875_v12  ;;  %vm654_vm8 = vcmp.eq.s32.totalorder %v3187_v33, %v3576_v62  ;;  %vm400_vm0 = vcmp.eq.s32.totalorder %v3239_v40, %v3558_v59 }
  0x81   :  { %2499 = vmatprep.subr.msk.mxu0 %vm403_vm2, %v2875_v12  ;;  %2535 = vmatprep.subr.msk.mxu1 %vm656_vm3, %v2875_v12 }
  0x82   :  { %1464 = vperm.xlu0 %2794, %v1428_v10   ;;  %1508 = vperm.xlu1 %2797, %v1490_v13  }
  0x83   :  { %2500 = vmatpush3.msk.msra.mxu0 %vm403_vm2, %v2875_v12  ;;  %2536 = vmatpush3.msk.msra.mxu1 %vm656_vm3, %v2875_v12  ;;  %vm653_vm2 = vcmp.eq.s32.totalorder %v3190_v34, %v3576_v62  ;;  %vm399_vm3 = vcmp.eq.s32.totalorder %v2957_v3, %v3558_v59 }
  0x84   :  { %2501 = vmatprep.subr.msk.mxu0 %vm402_vm4, %v2875_v12  ;;  %2537 = vmatprep.subr.msk.mxu1 %vm655_vm6, %v2875_v12 }
  0x85   :  { %2502 = vmatpush3.msk.msra.mxu0 %vm402_vm4, %v2875_v12  ;;  %2538 = vmatpush3.msk.msra.mxu1 %vm655_vm6, %v2875_v12  ;;  %vm652_vm4 = vcmp.eq.s32.totalorder %v3239_v40, %v3576_v62  ;;  %vm651_vm6 = vcmp.eq.s32.totalorder %v2957_v3, %v3576_v62 }
  0x86   :  { %2436 = vmatprep.mubr.f32.mxu0 %v308_v15  ;;  %2503 = vmatprep.subr.msk.mxu0 %vm401_vm7, %v2875_v12 }
  0x87   :  { %2539 = vmatprep.subr.msk.mxu1 %vm654_vm8, %v2875_v12  ;;  %2798 = vset.pattern.permute.xlu0 %v2873_v1 }
  0x88   :  { %2799 = vset.pattern.permute.xlu1 %v2874_v2  ;;  %2437 = vmatmul.mubr.f32.gmra.mxu0 %v309_v17  ;;  %v475_v2 = vld [vmem:[#allocation2 + $0xc8] sm:$0xff] }
  0x89   :  { %2540 = vmatpush3.msk.msra.mxu1 %vm654_vm8, %v2875_v12  ;;  %2504 = vmatpush3.msk.msra.mxu0 %vm401_vm7, %v2875_v12  ;;  %vm4347_vm7 = vcmp.eq.s32.totalorder %v2960_v4, %v3199_v35 }
  0x8a   :  { %1448 = vperm.xlu0 %2798, %v1430_v9   ;;  %1460 = vperm.xlu1 %2799, %v1427_v19   ;;  %vm4348_vm8 = vmmov %vm4347_vm7 }
  0x8b   :  { %2505 = vmatprep.subr.msk.mxu0 %vm400_vm0, %v2875_v12  ;;  %2541 = vmatprep.subr.msk.mxu1 %vm653_vm2, %v2875_v12 }
  0x8c   :  { %2474 = vmatprep.mubr.f32.mxu1 %v474_v21  ;;  %2506 = vmatpush3.msk.msra.mxu0 %vm400_vm0, %v2875_v12  ;;  %vm4349_vm0 = vcmp.eq.s32.totalorder %v2963_v5, %v3199_v35 }
  0x8d   :  { %2542 = vmatpush3.msk.msra.mxu1 %vm653_vm2, %v2875_v12  ;;  %2507 = vmatprep.subr.msk.mxu0 %vm399_vm3, %v2875_v12  ;;  %vm4350_vm2 = vcmp.eq.s32.totalorder %v2960_v4, %v3252_v41 }
  0x8e   :  { %2475 = vmatmul.mubr.f32.gmra.mxu1 %v475_v2  ;;  %2543 = vmatprep.subr.msk.mxu1 %vm652_vm4, %v2875_v12 }
  0x8f   :  { %2508 = vmatpush3.msk.msra.mxu0 %vm399_vm3, %v2875_v12  ;;  %2509 = vmatprep.mubr.f32.mxu0 %v431_v23  ;;  %vm4351_vm3 = vmmov %vm4349_vm0 }
  0x90   :  { %2544 = vmatpush3.msk.msra.mxu1 %vm652_vm4, %v2875_v12  ;;  %2800 = vset.pattern.permute.xlu1 %v2873_v1  ;;  %v1488_v1 = vld [vmem:[%s4291_s6 + $0x8] sm:$0xff]  ;;  %vm4352_vm4 = vmmov %vm4350_vm2 }
  0x91   :  { %1433 = vperm.xlu0 %2798, %v1427_v19   ;;  %2510 = vmatmul.mubr.f32.vlgmr.msra.gmra.mxu0 %v432_v25 }
  0x92   :  { %2545 = vmatprep.subr.msk.mxu1 %vm651_vm6, %v2875_v12  ;;  %2553 = vmatprep.subr.msk.mxu0 %vm4347_vm7, %v2875_v12  ;;  %vm4354_vm7 = vcmp.eq.s32.totalorder %v2963_v5, %v3252_v41 }
  0x93   :  { %1503 = vperm.xlu1 %2800, %v1489_v27   ;;  %2546 = vmatpush3.msk.msra.mxu1 %vm651_vm6, %v2875_v12  ;;  %vm4353_vm6 = vcmp.eq.s32.totalorder %v2966_v6, %v3199_v35 }
  0x94   :  { %2547 = vmatprep.mubr.f32.mxu1 %v683_v28  ;;  %2554 = vmatpush3.msk.msra.mxu0 %vm4348_vm8, %v2875_v12  ;;  %vm4355_vm8 = vmmov %vm4353_vm6 }
  0x95   :  { %2548 = vmatmul.mubr.f32.vlgmr.msra.gmra.mxu1 %v684_v29  ;;  %2555 = vmatprep.subr.msk.mxu0 %vm4349_vm0, %v2875_v12  ;;  %vm4356_vm0 = vmmov %vm4354_vm7 }
  0x96   :  { %2591 = vmatprep.subr.msk.mxu1 %vm4350_vm2, %v2875_v12  ;;  %2556 = vmatpush3.msk.msra.mxu0 %vm4351_vm3, %v2875_v12  ;;  %vm4357_vm2 = vcmp.eq.s32.totalorder %v2989_v11, %v3199_v35  ;;  %vm4358_vm3 = vcmp.eq.s32.totalorder %v2966_v6, %v3252_v41 }
  0x97   :  { %2592 = vmatpush3.msk.msra.mxu1 %vm4352_vm4, %v2875_v12  ;;  %1498 = vperm.xlu0 %2798, %v1488_v1   ;;  %vm4359_vm4 = vmmov %vm4357_vm2 }
  0x98   :  { %2557 = vmatprep.subr.msk.mxu0 %vm4353_vm6, %v2875_v12  ;;  %2593 = vmatprep.subr.msk.mxu1 %vm4354_vm7, %v2875_v12  ;;  %vm4360_vm6 = vmmov %vm4358_vm3  ;;  %vm791_vm7 = vcmp.eq.s32.totalorder %v3031_v16, %v3199_v35 }
  0x99   :  { %1493 = vperm.xlu1 %2800, %v1487_v32   ;;  %2558 = vmatpush3.msk.msra.mxu0 %vm4355_vm8, %v2875_v12  ;;  %vm4361_vm8 = vcmp.eq.s32.totalorder %v3010_v14, %v3199_v35 }
  0x9a   :  { %2594 = vmatpush3.msk.msra.mxu1 %vm4356_vm0, %v2875_v12  ;;  %2559 = vmatprep.subr.msk.mxu0 %vm4357_vm2, %v2875_v12  ;;  %vm4362_vm0 = vcmp.eq.s32.totalorder %v2989_v11, %v3252_v41  ;;  %vm4363_vm2 = vmmov %vm4361_vm8 }
  0x9b   :  { %2595 = vmatprep.subr.msk.mxu1 %vm4358_vm3, %v2875_v12  ;;  %2560 = vmatpush3.msk.msra.mxu0 %vm4359_vm4, %v2875_v12  ;;  %vm4364_vm3 = vmmov %vm4362_vm0  ;;  %vm790_vm4 = vcmp.eq.s32.totalorder %v3052_v18, %v3199_v35 }
  0x9c   :  { %2596 = vmatpush3.msk.msra.mxu1 %vm4360_vm6, %v2875_v12  ;;  %2561 = vmatprep.subr.msk.mxu0 %vm4361_vm8, %v2875_v12  ;;  %vm921_vm6 = vcmp.eq.s32.totalorder %v3031_v16, %v3252_v41  ;;  %vm4365_vm8 = vcmp.eq.s32.totalorder %v3010_v14, %v3252_v41  ;;  %v1668_v14 = vld [vmem:[%s4295_s10 + $0x18] sm:$0xff] }
  0x9d   :  { %2597 = vmatprep.subr.msk.mxu1 %vm4362_vm0, %v2875_v12  ;;  %2562 = vmatpush3.msk.msra.mxu0 %vm4363_vm2, %v2875_v12  ;;  %vm4366_vm0 = vmmov %vm4365_vm8  ;;  %vm789_vm2 = vcmp.eq.s32.totalorder %v3073_v20, %v3199_v35 }
  0x9e   :  { %2598 = vmatpush3.msk.msra.mxu1 %vm4364_vm3, %v2875_v12  ;;  %2563 = vmatprep.subr.msk.mxu0 %vm791_vm7, %v2875_v12  ;;  %vm920_vm3 = vcmp.eq.s32.totalorder %v3052_v18, %v3252_v41 }
  0x9f   :  { %2599 = vmatprep.subr.msk.mxu1 %vm4365_vm8, %v2875_v12  ;;  %2564 = vmatpush3.msk.msra.mxu0 %vm791_vm7, %v2875_v12  ;;  %vm788_vm7 = vcmp.eq.s32.totalorder %v3094_v22, %v3199_v35  ;;  %vm919_vm8 = vcmp.eq.s32.totalorder %v3073_v20, %v3252_v41 }
  0xa0   :  { %2600 = vmatpush3.msk.msra.mxu1 %vm4366_vm0, %v2875_v12  ;;  %2565 = vmatprep.subr.msk.mxu0 %vm790_vm4, %v2875_v12  ;;  %vm787_vm0 = vcmp.eq.s32.totalorder %v3115_v24, %v3199_v35 }
  0xa1   :  { %2601 = vmatprep.subr.msk.mxu1 %vm921_vm6, %v2875_v12  ;;  %2566 = vmatpush3.msk.msra.mxu0 %vm790_vm4, %v2875_v12  ;;  %vm918_vm4 = vcmp.eq.s32.totalorder %v3094_v22, %v3252_v41 }
  0xa2   :  { %2602 = vmatpush3.msk.msra.mxu1 %vm921_vm6, %v2875_v12  ;;  %2567 = vmatprep.subr.msk.mxu0 %vm789_vm2, %v2875_v12  ;;  %vm786_vm6 = vcmp.eq.s32.totalorder %v3136_v26, %v3199_v35 }
  0xa3   :  { %2603 = vmatprep.subr.msk.mxu1 %vm920_vm3, %v2875_v12  ;;  %2568 = vmatpush3.msk.msra.mxu0 %vm789_vm2, %v2875_v12  ;;  %vm917_vm2 = vcmp.eq.s32.totalorder %v3115_v24, %v3252_v41 }
  0xa4   :  { %2604 = vmatpush3.msk.msra.mxu1 %vm920_vm3, %v2875_v12  ;;  %2569 = vmatprep.subr.msk.mxu0 %vm788_vm7, %v2875_v12  ;;  %vm785_vm3 = vcmp.eq.s32.totalorder %v3163_v30, %v3199_v35 }
  0xa5   :  { %2605 = vmatprep.subr.msk.mxu1 %vm919_vm8, %v2875_v12  ;;  %2570 = vmatpush3.msk.msra.mxu0 %vm788_vm7, %v2875_v12  ;;  %vm916_vm7 = vcmp.eq.s32.totalorder %v3136_v26, %v3252_v41 }
  0xa6   :  { %2606 = vmatpush3.msk.msra.mxu1 %vm919_vm8, %v2875_v12  ;;  %2571 = vmatprep.subr.msk.mxu0 %vm787_vm0, %v2875_v12  ;;  %vm784_vm8 = vcmp.eq.s32.totalorder %v3187_v33, %v3199_v35 }
  0xa7   :  { %2607 = vmatprep.subr.msk.mxu1 %vm918_vm4, %v2875_v12  ;;  %2572 = vmatpush3.msk.msra.mxu0 %vm787_vm0, %v2875_v12  ;;  %vm915_vm0 = vcmp.eq.s32.totalorder %v3163_v30, %v3252_v41 }
  0xa8   :  { %2608 = vmatpush3.msk.msra.mxu1 %vm918_vm4, %v2875_v12  ;;  %2573 = vmatprep.subr.msk.mxu0 %vm786_vm6, %v2875_v12  ;;  %vm783_vm4 = vcmp.eq.s32.totalorder %v3190_v34, %v3199_v35 }
  0xa9   :  { %2609 = vmatprep.subr.msk.mxu1 %vm917_vm2, %v2875_v12  ;;  %2574 = vmatpush3.msk.msra.mxu0 %vm786_vm6, %v2875_v12  ;;  %vm914_vm6 = vcmp.eq.s32.totalorder %v3187_v33, %v3252_v41 }
  0xaa   :  { %2610 = vmatpush3.msk.msra.mxu1 %vm917_vm2, %v2875_v12  ;;  %2575 = vmatprep.subr.msk.mxu0 %vm785_vm3, %v2875_v12  ;;  %vm782_vm2 = vcmp.eq.s32.totalorder %v3239_v40, %v3199_v35 }
  0xab   :  { %2611 = vmatprep.subr.msk.mxu1 %vm916_vm7, %v2875_v12  ;;  %2576 = vmatpush3.msk.msra.mxu0 %vm785_vm3, %v2875_v12  ;;  %vm913_vm3 = vcmp.eq.s32.totalorder %v3190_v34, %v3252_v41 }
  0xac   :  { %2612 = vmatpush3.msk.msra.mxu1 %vm916_vm7, %v2875_v12  ;;  %2512 = vmatprep.mubr.f32.mxu0 %v433_v36  ;;  %vm781_vm7 = vcmp.eq.s32.totalorder %v2957_v3, %v3199_v35  ;;  %v943_v35 = vld [vmem:[#allocation2 + $0x20] sm:$0xff] }
  0xad   :  { %2577 = vmatprep.subr.msk.mxu0 %vm784_vm8, %v2875_v12  ;;  %2613 = vmatprep.subr.msk.mxu1 %vm915_vm0, %v2875_v12 }
  0xae   :  { %2513 = vmatmul.mubr.f32.gmra.mxu0 %v434_v37  ;;  %2614 = vmatpush3.msk.msra.mxu1 %vm915_vm0, %v2875_v12  ;;  %vm911_vm0 = vcmp.eq.s32.totalorder %v2957_v3, %v3252_v41 }
  0xaf   :  { %2578 = vmatpush3.msk.msra.mxu0 %vm784_vm8, %v2875_v12  ;;  %2550 = vmatprep.mubr.f32.mxu1 %v685_v38  ;;  %vm912_vm8 = vcmp.eq.s32.totalorder %v3239_v40, %v3252_v41  ;;  %v816_v41 = vld [vmem:[#allocation2 + $0xd8] sm:$0xff] }
  0xb0   :  { %2579 = vmatprep.subr.msk.mxu0 %vm783_vm4, %v2875_v12  ;;  %2615 = vmatprep.subr.msk.mxu1 %vm914_vm6, %v2875_v12 }
  0xb1   :  { %2551 = vmatmul.mubr.f32.gmra.mxu1 %v686_v39  ;;  %2580 = vmatpush3.msk.msra.mxu0 %vm783_vm4, %v2875_v12  ;;  %vm4367_vm4 = vcmp.eq.s32.totalorder %v2960_v4, %v3360_v51 }
  0xb2   :  { %2616 = vmatpush3.msk.msra.mxu1 %vm914_vm6, %v2875_v12  ;;  %2581 = vmatprep.subr.msk.mxu0 %vm782_vm2, %v2875_v12  ;;  %vm4368_vm6 = vmmov %vm4367_vm4 }
  0xb3   :  { %2617 = vmatprep.subr.msk.mxu1 %vm913_vm3, %v2875_v12  ;;  %2582 = vmatpush3.msk.msra.mxu0 %vm782_vm2, %v2875_v12  ;;  %vm4369_vm2 = vcmp.eq.s32.totalorder %v2963_v5, %v3360_v51 }
  0xb4   :  { %2618 = vmatpush3.msk.msra.mxu1 %vm913_vm3, %v2875_v12  ;;  %2583 = vmatprep.subr.msk.mxu0 %vm781_vm7, %v2875_v12  ;;  %vm4370_vm3 = vcmp.eq.s32.totalorder %v2960_v4, %v3363_v52  ;;  %v1534_v4 = vld [vmem:[%s4293_s8 + $0x18] sm:$0xff] }
  0xb5   :  { %2619 = vmatprep.subr.msk.mxu1 %vm912_vm8, %v2875_v12  ;;  %2584 = vmatpush3.msk.msra.mxu0 %vm781_vm7, %v2875_v12  ;;  %vm4371_vm7 = vmmov %vm4369_vm2 }
  0xb6   :  { %2585 = vmatprep.mubr.f32.mxu0 %v813_v42  ;;  %2620 = vmatpush3.msk.msra.mxu1 %vm912_vm8, %v2875_v12  ;;  %vm4372_vm8 = vmmov %vm4370_vm3 }
  0xb7   :  { %2586 = vmatmul.mubr.f32.vlgmr.msra.gmra.mxu0 %v814_v43  ;;  %2621 = vmatprep.subr.msk.mxu1 %vm911_vm0, %v2875_v12 }
  0xb8   :  { %2629 = vmatprep.subr.msk.mxu0 %vm4367_vm4, %v2875_v12  ;;  %2622 = vmatpush3.msk.msra.mxu1 %vm911_vm0, %v2875_v12  ;;  %vm4373_vm0 = vcmp.eq.s32.totalorder %v2966_v6, %v3360_v51  ;;  %vm4374_vm4 = vcmp.eq.s32.totalorder %v2963_v5, %v3363_v52  ;;  %v1533_v5 = vld [vmem:[%s4293_s8 + $0x10] sm:$0xff]  ;;  %v1532_v6 = vld [vmem:[%s4293_s8 + $0x8] sm:$0xff] }
  0xb9   :  { %2623 = vmatprep.mubr.f32.mxu1 %v943_v35  ;;  %2630 = vmatpush3.msk.msra.mxu0 %vm4368_vm6, %v2875_v12  ;;  %vm4375_vm6 = vmmov %vm4373_vm0 }
  0xba   :  { %2624 = vmatmul.mubr.f32.vlgmr.msra.gmra.mxu1 %v944_v44  ;;  %2631 = vmatprep.subr.msk.mxu0 %vm4369_vm2, %v2875_v12  ;;  %vm4376_vm2 = vmmov %vm4374_vm4 }
  0xbb   :  { %2667 = vmatprep.subr.msk.mxu1 %vm4370_vm3, %v2875_v12  ;;  %2588 = vmatprep.mubr.f32.mxu0 %v815_v45  ;;  %vm4377_vm3 = vcmp.eq.s32.totalorder %v2989_v11, %v3360_v51  ;;  %v1531_v11 = vld [vmem:[%s4293_s8] sm:$0xff] }
  0xbc   :  { %2632 = vmatpush3.msk.msra.mxu0 %vm4371_vm7, %v2875_v12  ;;  %2668 = vmatpush3.msk.msra.mxu1 %vm4372_vm8, %v2875_v12  ;;  %vm4378_vm7 = vmmov %vm4377_vm3  ;;  %vm1051_vm8 = vcmp.eq.s32.totalorder %v3031_v16, %v3360_v51 }
  0xbd   :  { %2589 = vmatmul.mubr.f32.gmra.mxu0 %v816_v41  ;;  %2633 = vmatprep.subr.msk.mxu0 %vm4373_vm0, %v2875_v12  ;;  %vm1181_vm0 = vcmp.eq.s32.totalorder %v3031_v16, %v3363_v52  ;;  %v1477_v41 = vsub.s32 1, %v2957_v3 }
  0xbe   :  { %2669 = vmatprep.subr.msk.mxu1 %vm4374_vm4, %v2875_v12  ;;  %2626 = vmatprep.mubr.f32.mxu1 %v945_v46  ;;  %vm1048_vm4 = vcmp.eq.s32.totalorder %v3094_v22, %v3360_v51 }
  0xbf   :  { %2634 = vmatpush3.msk.msra.mxu0 %vm4375_vm6, %v2875_v12  ;;  %2670 = vmatpush3.msk.msra.mxu1 %vm4376_vm2, %v2875_v12  ;;  %vm1047_vm6 = vcmp.eq.s32.totalorder %v3115_v24, %v3360_v51  ;;  %vm1178_vm2 = vcmp.eq.s32.totalorder %v3094_v22, %v3363_v52 }
  0xc0   :  { %2635 = vmatprep.subr.msk.mxu0 %vm4377_vm3, %v2875_v12  ;;  %2627 = vmatmul.mubr.f32.gmra.mxu1 %v946_v47  ;;  %vm1046_vm3 = vcmp.eq.s32.totalorder %v3136_v26, %v3360_v51  ;;  %v1426_v47 = vld [vmem:[%s4285_s0] sm:$0x3] }
  0xc1   :  { %2671 = vmatprep.subr.msk.mxu1 %vm1184_vm11, %v2875_v12  ;;  %2636 = vmatpush3.msk.msra.mxu0 %vm4378_vm7, %v2875_v12  ;;  %vm1177_vm7 = vcmp.eq.s32.totalorder %v3115_v24, %v3363_v52 }
  0xc2   :  { %2672 = vmatpush3.msk.msra.mxu1 %vm1184_vm11, %v2875_v12  ;;  %2637 = vmatprep.subr.msk.mxu0 %vm1052_vm1, %v2875_v12  ;;  %vm1050_vm11 = vcmp.eq.s32.totalorder %v3052_v18, %v3360_v51 }
  0xc3   :  { %2673 = vmatprep.subr.msk.mxu1 %vm1183_vm10, %v2875_v12  ;;  %2638 = vmatpush3.msk.msra.mxu0 %vm1052_vm1, %v2875_v12  ;;  %vm1180_vm1 = vcmp.eq.s32.totalorder %v3052_v18, %v3363_v52 }
  0xc4   :  { %2674 = vmatpush3.msk.msra.mxu1 %vm1183_vm10, %v2875_v12  ;;  %2639 = vmatprep.subr.msk.mxu0 %vm1051_vm8, %v2875_v12  ;;  %vm1049_vm10 = vcmp.eq.s32.totalorder %v3073_v20, %v3360_v51 }
  0xc5   :  { %2675 = vmatprep.subr.msk.mxu1 %vm1182_vm14, %v2875_v12  ;;  %2640 = vmatpush3.msk.msra.mxu0 %vm1051_vm8, %v2875_v12  ;;  %vm1045_vm8 = vcmp.eq.s32.totalorder %v3163_v30, %v3360_v51 }
  0xc6   :  { %2676 = vmatpush3.msk.msra.mxu1 %vm1182_vm14, %v2875_v12  ;;  %2641 = vmatprep.subr.msk.mxu0 %vm1050_vm11, %v2875_v12  ;;  %vm1179_vm14 = vcmp.eq.s32.totalorder %v3073_v20, %v3363_v52 }
  0xc7   :  { %2677 = vmatprep.subr.msk.mxu1 %vm1181_vm0, %v2875_v12  ;;  %2642 = vmatpush3.msk.msra.mxu0 %vm1050_vm11, %v2875_v12  ;;  %vm1176_vm11 = vcmp.eq.s32.totalorder %v3136_v26, %v3363_v52 }
  0xc8   :  { %2678 = vmatpush3.msk.msra.mxu1 %vm1181_vm0, %v2875_v12  ;;  %2643 = vmatprep.subr.msk.mxu0 %vm1049_vm10, %v2875_v12  ;;  %vm1044_vm0 = vcmp.eq.s32.totalorder %v3187_v33, %v3360_v51 }
  0xc9   :  { %2679 = vmatprep.subr.msk.mxu1 %vm1180_vm1, %v2875_v12  ;;  %2644 = vmatpush3.msk.msra.mxu0 %vm1049_vm10, %v2875_v12  ;;  %vm1175_vm10 = vcmp.eq.s32.totalorder %v3163_v30, %v3363_v52 }
  0xca   :  { %2680 = vmatpush3.msk.msra.mxu1 %vm1180_vm1, %v2875_v12  ;;  %2645 = vmatprep.subr.msk.mxu0 %vm1048_vm4, %v2875_v12  ;;  %vm1043_vm1 = vcmp.eq.s32.totalorder %v3190_v34, %v3360_v51 }
  0xcb   :  { %2681 = vmatprep.subr.msk.mxu1 %vm1179_vm14, %v2875_v12  ;;  %2646 = vmatpush3.msk.msra.mxu0 %vm1048_vm4, %v2875_v12  ;;  %vm1174_vm4 = vcmp.eq.s32.totalorder %v3187_v33, %v3363_v52 }
  0xcc   :  { %2682 = vmatpush3.msk.msra.mxu1 %vm1179_vm14, %v2875_v12  ;;  %2647 = vmatprep.subr.msk.mxu0 %vm1047_vm6, %v2875_v12  ;;  %vm1042_vm14 = vcmp.eq.s32.totalorder %v3239_v40, %v3360_v51 }
  0xcd   :  { %2683 = vmatprep.subr.msk.mxu1 %vm1178_vm2, %v2875_v12  ;;  %2648 = vmatpush3.msk.msra.mxu0 %vm1047_vm6, %v2875_v12  ;;  %vm1173_vm6 = vcmp.eq.s32.totalorder %v3190_v34, %v3363_v52 }
  0xce   :  { %2684 = vmatpush3.msk.msra.mxu1 %vm1178_vm2, %v2875_v12  ;;  %2649 = vmatprep.subr.msk.mxu0 %vm1046_vm3, %v2875_v12  ;;  %vm1041_vm2 = vcmp.eq.s32.totalorder %v2957_v3, %v3360_v51  ;;  %v1204_v51 = vld [vmem:[#allocation2 + $0x70] sm:$0xff] }
  0xcf   :  { %2685 = vmatprep.subr.msk.mxu1 %vm1177_vm7, %v2875_v12  ;;  %2650 = vmatpush3.msk.msra.mxu0 %vm1046_vm3, %v2875_v12  ;;  %vm1172_vm3 = vcmp.eq.s32.totalorder %v3239_v40, %v3363_v52 }
  0xd0   :  { %2686 = vmatpush3.msk.msra.mxu1 %vm1177_vm7, %v2875_v12  ;;  %2651 = vmatprep.subr.msk.mxu0 %vm1045_vm8, %v2875_v12  ;;  %vm1171_vm7 = vcmp.eq.s32.totalorder %v2957_v3, %v3363_v52  ;;  %v1205_v52 = vld [vmem:[#allocation2 + $0xb0] sm:$0xff] }
  0xd1   :  { %2687 = vmatprep.subr.msk.mxu1 %vm1176_vm11, %v2875_v12  ;;  %2652 = vmatpush3.msk.msra.mxu0 %vm1045_vm8, %v2875_v12  ;;  %vm1306_vm8 = vcmp.eq.s32.totalorder %v3136_v26, %v3504_v54  ;;  %v1335_v26 = vld [vmem:[#allocation2 + $0xb8] sm:$0xff] }
  0xd2   :  { %2688 = vmatpush3.msk.msra.mxu1 %vm1176_vm11, %v2875_v12  ;;  %2653 = vmatprep.subr.msk.mxu0 %vm1044_vm0, %v2875_v12  ;;  %vm1305_vm11 = vcmp.eq.s32.totalorder %v3163_v30, %v3504_v54  ;;  %v1336_v30 = vld [vmem:[#allocation2 + $0xf8] sm:$0xff] }
  0xd3   :  { %2689 = vmatprep.subr.msk.mxu1 %vm1175_vm10, %v2875_v12  ;;  %2654 = vmatpush3.msk.msra.mxu0 %vm1044_vm0, %v2875_v12  ;;  %vm1304_vm0 = vcmp.eq.s32.totalorder %v3187_v33, %v3504_v54  ;;  %v1527_v33 = vld [vmem:[%s4292_s7] sm:$0xff] }
  0xd4   :  { %2690 = vmatpush3.msk.msra.mxu1 %vm1175_vm10, %v2875_v12  ;;  %2655 = vmatprep.subr.msk.mxu0 %vm1043_vm1, %v2875_v12  ;;  %vm1303_vm10 = vcmp.eq.s32.totalorder %v3190_v34, %v3504_v54 }
  0xd5   :  { %2691 = vmatprep.subr.msk.mxu1 %vm1174_vm4, %v2875_v12  ;;  %2656 = vmatpush3.msk.msra.mxu0 %vm1043_vm1, %v2875_v12  ;;  %vm1302_vm1 = vcmp.eq.s32.totalorder %v3239_v40, %v3504_v54 }
  0xd6   :  { %2692 = vmatpush3.msk.msra.mxu1 %vm1174_vm4, %v2875_v12  ;;  %2657 = vmatprep.subr.msk.mxu0 %vm1042_vm14, %v2875_v12  ;;  %vm1301_vm4 = vcmp.eq.s32.totalorder %v2957_v3, %v3504_v54 }
  0xd7   :  { %2693 = vmatprep.subr.msk.mxu1 %vm1173_vm6, %v2875_v12  ;;  %2658 = vmatpush3.msk.msra.mxu0 %vm1042_vm14, %v2875_v12  ;;  %vm1555_vm14 = vcmask 261120  }
  0xd8   :  { %2694 = vmatpush3.msk.msra.mxu1 %vm1173_vm6, %v2875_v12  ;;  %2659 = vmatprep.subr.msk.mxu0 %vm1041_vm2, %v2875_v12  ;;  %vm2877_vm6 = vmmov 0  }
  0xd9   :  { %2695 = vmatprep.subr.msk.mxu1 %vm1172_vm3, %v2875_v12  ;;  %2660 = vmatpush3.msk.msra.mxu0 %vm1041_vm2, %v2875_v12 }
  0xda   :  { %2661 = vmatprep.mubr.f32.mxu0 %v1073_v48  ;;  %2696 = vmatpush3.msk.msra.mxu1 %vm1172_vm3, %v2875_v12 }
  0xdb   :  { %2662 = vmatmul.mubr.f32.vlgmr.msra.gmra.mxu0 %v1074_v49  ;;  %2697 = vmatprep.subr.msk.mxu1 %vm1171_vm7, %v2875_v12 }
  0xdc   :  { %2705 = vmatprep.subr.msk.mxu0 %vm1316_vm15, %v2875_v12  ;;  %2698 = vmatpush3.msk.msra.mxu1 %vm1171_vm7, %v2875_v12 }
  0xdd   :  { %2699 = vmatprep.mubr.f32.mxu1 %v1203_v50  ;;  %2706 = vmatpush3.msk.msra.mxu0 %vm1316_vm15, %v2875_v12  ;;  %vm1311_vm15 = vcmp.eq.s32.totalorder %v3031_v16, %v3504_v54  ;;  %v1667_v16 = vld [vmem:[%s4295_s10 + $0x10] sm:$0xff] }
  0xde   :  { %2700 = vmatmul.mubr.f32.vlgmr.msra.gmra.mxu1 %v1204_v51  ;;  %2707 = vmatprep.subr.msk.mxu0 %vm1315_vm5, %v2875_v12 }
  0xdf   :  { %2664 = vmatprep.mubr.f32.mxu0 %v1075_v53  ;;  %2708 = vmatpush3.msk.msra.mxu0 %vm1315_vm5, %v2875_v12  ;;  %vm1310_vm5 = vcmp.eq.s32.totalorder %v3052_v18, %v3504_v54  ;;  %v1666_v18 = vld [vmem:[%s4295_s10 + $0x8] sm:$0xff] }
  0xe0   :  { %2702 = vmatprep.mubr.f32.mxu1 %v1205_v52  ;;  %2665 = vmatmul.mubr.f32.gmra.mxu0 %v1076_v55 }
  0xe1   :  { %2709 = vmatprep.subr.msk.mxu0 %vm1314_vm12, %v2875_v12  ;;  %2737 = vmatprep.mubr.f32.mxu0 %v1333_v57  ;;  %v1478_v57 = vrot.slane %v1426_v47, %v1477_v41 }
  0xe2   :  { %2710 = vmatpush3.msk.msra.mxu0 %vm1314_vm12, %v2875_v12  ;;  %2703 = vmatmul.mubr.f32.gmra.mxu1 %v1206_v56  ;;  %vm1309_vm12 = vcmp.eq.s32.totalorder %v3073_v20, %v3504_v54  ;;  %v1665_v20 = vld [vmem:[%s4295_s10] sm:$0xff]  ;;  %v1454_v56 = vrot.slane %v1426_v47, %v3172_v31 }
  0xe3   :  { %2711 = vmatprep.subr.msk.mxu0 %vm1313_vm13, %v2875_v12  ;;  %1552 = vperm.xlu0 %2798, %v1534_v4  }
  0xe4   :  { %2712 = vmatpush3.msk.msra.mxu0 %vm1313_vm13, %v2875_v12  ;;  %1547 = vperm.xlu1 %2800, %v1533_v5   ;;  %vm1308_vm13 = vcmp.eq.s32.totalorder %v3094_v22, %v3504_v54  ;;  %v1795_v22 = vld [vmem:[%s4297_s12] sm:$0x3] }
  0xe5   :  { %2713 = vmatprep.subr.msk.mxu0 %vm1312_vm9, %v2875_v12  ;;  %2751 = vmatprep.mubr.msk.f32.mxu1 %vm1555_vm14, %v1527_v33 }
  0xe6   :  { %2714 = vmatpush3.msk.msra.mxu0 %vm1312_vm9, %v2875_v12  ;;  %vm1307_vm9 = vcmp.eq.s32.totalorder %v3115_v24, %v3504_v54  ;;  %v1334_v24 = vld [vmem:[#allocation2 + $0x78] sm:$0xff] }
  0xe7   :  { %2715 = vmatprep.subr.msk.mxu0 %vm1311_vm15, %v2875_v12  ;;  %1542 = vperm.xlu0 %2798, %v1532_v6  }
  0xe8   :  { %2716 = vmatpush3.msk.msra.mxu0 %vm1311_vm15, %v2875_v12  ;;  %1537 = vperm.xlu1 %2800, %v1531_v11  }
  0xe9   :  { %2717 = vmatprep.subr.msk.mxu0 %vm1310_vm5, %v2875_v12 }
  0xea   :  { %2718 = vmatpush3.msk.msra.mxu0 %vm1310_vm5, %v2875_v12 }
  0xeb   :  { %2719 = vmatprep.subr.msk.mxu0 %vm1309_vm12, %v2875_v12  ;;  %1686 = vperm.xlu0 %2798, %v1668_v14  }
  0xec   :  { %2720 = vmatpush3.msk.msra.mxu0 %vm1309_vm12, %v2875_v12  ;;  %1681 = vperm.xlu1 %2800, %v1667_v16   ;;  %v1444_v21 = vpop.permute.xlu1 %1443 }
  0xed   :  { %2721 = vmatprep.subr.msk.mxu0 %vm1308_vm13, %v2875_v12 }
  0xee   :  { %2722 = vmatpush3.msk.msra.mxu0 %vm1308_vm13, %v2875_v12 }
  0xef   :  { %2723 = vmatprep.subr.msk.mxu0 %vm1307_vm9, %v2875_v12  ;;  %1676 = vperm.xlu0 %2798, %v1666_v18  }
  0xf0   :  { %2724 = vmatpush3.msk.msra.mxu0 %vm1307_vm9, %v2875_v12  ;;  %1671 = vperm.xlu1 %2800, %v1665_v20  }
  0xf1   :  { %2725 = vmatprep.subr.msk.mxu0 %vm1306_vm8, %v2875_v12 }
  0xf2   :  { %2726 = vmatpush3.msk.msra.mxu0 %vm1306_vm8, %v2875_v12  ;;  %v1469_v28 = vpop.permute.xlu1 %1468 }
  0xf3   :  { %2727 = vmatprep.subr.msk.mxu0 %vm1305_vm11, %v2875_v12  ;;  %1798 = vperm.xlu0 %2798, %v1795_v22  }
  0xf4   :  { %2728 = vmatpush3.msk.msra.mxu0 %vm1305_vm11, %v2875_v12 }
  0xf5   :  { %2729 = vmatprep.subr.msk.mxu0 %vm1304_vm0, %v2875_v12 }
  0xf6   :  { %2730 = vmatpush3.msk.msra.mxu0 %vm1304_vm0, %v2875_v12 }
  0xf7   :  { %2731 = vmatprep.subr.msk.mxu0 %vm1303_vm10, %v2875_v12 }
  0xf8   :  { %2732 = vmatpush3.msk.msra.mxu0 %vm1303_vm10, %v2875_v12  ;;  %v1473_v32 = vpop.permute.xlu0 %1472  ;;  %v1439_v38 = vpop.permute.xlu1 %1438 }
  0xf9   :  { %2733 = vmatprep.subr.msk.mxu0 %vm1302_vm1, %v2875_v12  ;;  %v1482_v3 = vmul.f32 %v1478_v57, %v1473_v32  ;;  %v1456_v33 = vmul.f32 %v1454_v56, %v1439_v38 }
  0xfa   :  { %2734 = vmatpush3.msk.msra.mxu0 %vm1302_vm1, %v2875_v12 }
  0xfb   :  { %2735 = vmatprep.subr.msk.mxu0 %vm1301_vm4, %v2875_v12 }
  0xfc   :  { %2736 = vmatpush3.msk.msra.mxu0 %vm1301_vm4, %v2875_v12 }
  0xfd   :  { %2738 = vmatmul.mubr.f32.vlgmr.msra.gmra.mxu0 %v1334_v24  ;;  %v1465_v43 = vpop.permute.xlu0 %1464  ;;  %v1509_v35 = vpop.permute.xlu1 %1508 }
  0xfe   :  { %2740 = vmatprep.mubr.f32.mxu0 %v1335_v26  ;;  %v1457_v26 = vmul.f32 %v1454_v56, %v1444_v21 }
 0x101   :  { %2741 = vmatmul.mubr.f32.gmra.mxu0 %v1336_v30  ;;  %v1481_v30 = vmul.f32 %v1478_v57, %v1469_v28 }
 0x103   :  { %v1485_v32 = vadd.f32 %v1481_v30, %v1457_v26 }
 0x104   :  { %v4221_v34 = vpop.f32.mrf.mxu0 }
 0x105   :  { %v1449_v48 = vpop.permute.xlu0 %1448  ;;  %v1461_v53 = vpop.permute.xlu1 %1460 }
 0x106   :  { %v4223_v40 = vpop.f32.mrf.mxu1  ;;  %v4225_v54 = vpop.f32.mrf.mxu0  ;;  %v1458_v14 = vmul.f32 %v1454_v56, %v1449_v48 }
 0x108   :  { %v4229_v12 = vpop.f32.mrf.mxu1 }
 0x10c   :  { %v1434_v16 = vpop.permute.xlu0 %1433 }
 0x11f   :  { %v4227_v58 = vpop.f32.mrf.mxu0 }
 0x121   :  { %v4233_v60 = vpop.f32.mrf.mxu0 }
 0x124   :  { %v4231_v59 = vpop.f32.mrf.mxu1 }
 0x126   :  { %v4235_v61 = vpop.f32.mrf.mxu1  ;;  %v4237_v62 = vpop.f32.mrf.mxu0 }
 0x128   :  { %v4239_v0 = vpop.f32.mrf.mxu0 }
 0x12a   :  { %v2473_v63 = vpop.f32.mrf.mxu1 }
 0x12c   :  { %v542_v8 = vpop.f32.mrf.mxu1 }
 0x148   :  { %v4241_v7 = vpop.f32.mrf.mxu0 }
 0x14a   :  { %v4243_v9 = vpop.f32.mrf.mxu0 }
 0x14e   :  { %v2476_v10 = vpop.f32.mrf.mxu1 }
 0x150   :  { %v552_v13 = vpop.f32.mrf.mxu1 }
 0x151   :  { %v2511_v15 = vpop.f32.mrf.mxu0 }
 0x152   :  { %v633_v49 = vadd.f32 %v2511_v15, %v2473_v63  ;;  %v1480_v63 = vmul.f32 %v1478_v57, %v1465_v43 }
 0x153   :  { %v627_v17 = vpop.f32.mrf.mxu0 }
 0x154   :  { %v628_v52 = vadd.f32 %v627_v17, %v542_v8  ;;  %v1486_v17 = vadd.f32 %v1482_v3, %v1458_v14  ;;  %v1484_v41 = vadd.f32 %v1480_v63, %v1456_v33  ;;  %v1661_v63 = vld [vmem:[#allocation5] sm:$0xff] }
 0x155   :  { %v2549_v19 = vpop.f32.mrf.mxu1 }
 0x156   :  { %v773_v6 = vadd.f32 %v2549_v19, %v633_v49  ;;  %v1455_v19 = vmul.f32 %v1454_v56, %v1434_v16  ;;  %v1514_v47 = vadd.f32 %v1509_v35, %v1486_v17 }
 0x157   :  { %v753_v23 = vpop.f32.mrf.mxu1 }
 0x158   :  { %v772_v18 = vadd.f32 %v753_v23, %v628_v52 }
 0x16e   :  { %v2514_v2 = vpop.f32.mrf.mxu0 }
 0x16f   :  { %v643_v50 = vadd.f32 %v2514_v2, %v2476_v10  ;;  %v1479_v2 = vmul.f32 %v1478_v57, %v1461_v53  ;;  %v1518_v57 = vadd.f32 %v4227_v58, %v1514_v47  ;;  %v1662_v47 = vld [vmem:[#allocation5 + $0x8] sm:$0xff] }
 0x170   :  { %v637_v25 = vpop.f32.mrf.mxu0 }
 0x171   :  { %v2552_v27 = vpop.f32.mrf.mxu1  ;;  %v638_v55 = vadd.f32 %v637_v25, %v552_v13  ;;  %v1504_v13 = vpop.permute.xlu1 %1503  ;;  %v1483_v43 = vadd.f32 %v1479_v2, %v1455_v19 }
 0x172   :  { %v775_v11 = vadd.f32 %v2552_v27, %v643_v50 }
 0x173   :  { %v763_v1 = vpop.f32.mrf.mxu1 }
 0x174   :  { %v774_v20 = vadd.f32 %v763_v1, %v638_v55 }
 0x175   :  { %v1494_v49 = vpop.permute.xlu1 %1493 }
 0x176   :  { %v1511_v56 = vadd.f32 %v1494_v49, %v1483_v43 }
 0x177   :  { %v2587_v29 = vpop.f32.mrf.mxu0 }
 0x178   :  { %v903_v22 = vadd.f32 %v2587_v29, %v773_v6  ;;  %v1499_v29 = vpop.permute.xlu0 %1498 }
 0x179   :  { %v883_v36 = vpop.f32.mrf.mxu0  ;;  %v1512_v50 = vadd.f32 %v1499_v29, %v1484_v41 }
 0x17a   :  { %v2625_v37 = vpop.f32.mrf.mxu1  ;;  %v902_v31 = vadd.f32 %v883_v36, %v772_v18 }
 0x17b   :  { %v1033_v25 = vadd.f32 %v2625_v37, %v903_v22  ;;  %v1513_v37 = vadd.f32 %v1504_v13, %v1485_v32  ;;  %v1516_v35 = vadd.f32 %v4221_v34, %v1512_v50  ;;  %v1528_v34 = vld [vmem:[%s4292_s7 + $0x8] sm:$0xff] }
 0x17c   :  { %v1013_v42 = vpop.f32.mrf.mxu1 }
 0x17d   :  { %v2590_v39 = vpop.f32.mrf.mxu0 }
 0x17e   :  { %v905_v24 = vadd.f32 %v2590_v39, %v775_v11  ;;  %v1032_v39 = vadd.f32 %v1013_v42, %v902_v31 }
 0x17f   :  { %v893_v44 = vpop.f32.mrf.mxu0 }
 0x180   :  { %v2628_v45 = vpop.f32.mrf.mxu1  ;;  %v904_v15 = vadd.f32 %v893_v44, %v774_v20  ;;  %v1515_v20 = vadd.f32 %v1511_v56, %v4225_v54  ;;  %v1529_v54 = vld [vmem:[%s4292_s7 + $0x10] sm:$0xff] }
 0x181   :  { %v1035_v27 = vadd.f32 %v2628_v45, %v905_v24 }
 0x182   :  { %v1023_v51 = vpop.f32.mrf.mxu1 }
 0x183   :  { %v1034_v21 = vadd.f32 %v1023_v51, %v904_v15 }
 0x19b   :  { %v2663_v46 = vpop.f32.mrf.mxu0 }
 0x19c   :  { %v1163_v28 = vadd.f32 %v2663_v46, %v1033_v25 }
 0x19d   :  { %v1143_v4 = vpop.f32.mrf.mxu0 }
 0x19e   :  { %v2701_v5 = vpop.f32.mrf.mxu1  ;;  %v1162_v36 = vadd.f32 %v1143_v4, %v1032_v39  ;;  %v1517_v4 = vadd.f32 %v1513_v37, %v4233_v60  ;;  %v1530_v60 = vld [vmem:[%s4292_s7 + $0x18] sm:$0xff] }
 0x19f   :  { %v1293_v45 = vadd.f32 %v2701_v5, %v1163_v28 }
 0x1a0   :  { %v2666_v8 = vpop.f32.mrf.mxu0  ;;  %v1273_v10 = vpop.f32.mrf.mxu1 }
 0x1a1   :  { %v1165_v38 = vadd.f32 %v2666_v8, %v1035_v27  ;;  %v1292_v42 = vadd.f32 %v1273_v10, %v1162_v36  ;;  %v1553_v8 = vpop.permute.xlu0 %1552  ;;  %v1548_v10 = vpop.permute.xlu1 %1547 }
 0x1a2   :  { %v1153_v23 = vpop.f32.mrf.mxu0  ;;  %v2704_v1 = vpop.f32.mrf.mxu1 }
 0x1a3   :  { %v1164_v44 = vadd.f32 %v1153_v23, %v1034_v21  ;;  %v1295_v55 = vadd.f32 %v2704_v1, %v1165_v38 }
 0x1a4   :  { %v1283_v53 = vpop.f32.mrf.mxu1 }
 0x1a5   :  { %v1294_v51 = vadd.f32 %v1283_v53, %v1164_v44  ;;  %v1543_v15 = vpop.permute.xlu0 %1542  ;;  %v1538_v25 = vpop.permute.xlu1 %1537 }
 0x1bd   :  { %v2739_v48 = vpop.f32.mrf.mxu0 }
 0x1be   :  { %v1423_v46 = vadd.f32 %v2739_v48, %v1293_v45  ;;  %v1682_v48 = vpop.permute.xlu1 %1681 }
 0x1bf   :  { %v1403_v52 = vpop.f32.mrf.mxu0 }
 0x1c0   :  { %v1422_v14 = vadd.f32 %v1403_v52, %v1292_v42  ;;  %v1520_v5 = vadd.f32 %v1516_v35, %v1423_v46 }
 0x1c1   :  { %v2742_v6 = vpop.f32.mrf.mxu0 }
 0x1c2   :  { %v1425_v11 = vadd.f32 %v2742_v6, %v1295_v55  ;;  %v1519_v26 = vadd.f32 %v1515_v20, %v1422_v14  ;;  %v1524_v30 = vmax.f32 %v1520_v5, 0.0  ;;  %v1672_v37 = vpop.permute.xlu1 %1671 }
 0x1c3   :  { %v1413_v3 = vpop.f32.mrf.mxu0 }
 0x1c4   :  { %v1522_v16 = vadd.f32 %v1518_v57, %v1425_v11  ;;  %v1424_v18 = vadd.f32 %v1413_v3, %v1294_v51  ;;  %v1523_v33 = vmax.f32 %v1519_v26, 0.0 }
 0x1c6   :  { %v1526_v22 = vmax.f32 %v1522_v16, 0.0  ;;  %v1521_v24 = vadd.f32 %v1517_v4, %v1424_v18 }
 0x1c8   :  { %v1525_v58 = vmax.f32 %v1521_v24, 0.0  ;;  %2743 = vmatprep.subr.mxu1 %v1526_v22 }
 0x1c9   :  { %2744 = vmatpush3.msra.mxu1 %v1526_v22 }
 0x1ca   :  { %2745 = vmatprep.subr.mxu1 %v1525_v58 }
 0x1cb   :  { %2746 = vmatpush3.msra.mxu1 %v1525_v58 }
 0x1cc   :  { %2747 = vmatprep.subr.mxu1 %v1524_v30 }
 0x1cd   :  { %2748 = vmatpush3.msra.mxu1 %v1524_v30 }
 0x1ce   :  { %2749 = vmatprep.subr.mxu1 %v1523_v33 }
 0x1cf   :  { %2750 = vmatpush3.msra.mxu1 %v1523_v33 }
 0x1d0   :  { %2752 = vmatmul.mubr.msk.f32.vlgmr.msra.gmra.mxu1 %vm1555_vm14, %v1528_v34 }
 0x1d1   :  { %2754 = vmatprep.mubr.msk.f32.mxu1 %vm1555_vm14, %v1529_v54 }
 0x1d4   :  { %2755 = vmatmul.mubr.msk.f32.gmra.mxu1 %vm1555_vm14, %v1530_v60 }
 0x1d5   :  { %2765 = vmatprep.mubr.msk.f32.mxu1 %vm1555_vm14, %v1661_v63 }
 0x290   :  { %v2753_v13 = vpop.f32.mrf.mxu1 }
 0x291   :  { %v1640_v2 = vadd.f32 %v2753_v13, %v1543_v15 }
 0x292   :  { %v1634_v31 = vpop.f32.mrf.mxu1 }
 0x293   :  { %v1635_v32 = vadd.f32 %v1634_v31, %v1538_v25  ;;  %v1654_v1 = vadd.f32 %v4223_v40, %v1640_v2  ;;  %v1664_v40 = vld [vmem:[#allocation5 + $0x18] sm:$0xff] }
 0x294   :  { %v2756_v17 = vpop.f32.mrf.mxu1 }
 0x295   :  { %v1650_v19 = vadd.f32 %v2756_v17, %v1553_v8  ;;  %v1653_v21 = vadd.f32 %v1635_v32, %v4229_v12  ;;  %v1658_v38 = vmax.f32 %v1654_v1, 0.0  ;;  %v2876_v12 = vmov 0.0  }
 0x296   :  { %v1644_v27 = vpop.f32.mrf.mxu1 }
 0x297   :  { %v1656_v41 = vadd.f32 %v4231_v59, %v1650_v19  ;;  %v1645_v23 = vadd.f32 %v1644_v27, %v1548_v10  ;;  %v1657_v43 = vmax.f32 %v1653_v21, 0.0  ;;  %v1663_v59 = vld [vmem:[#allocation5 + $0x10] sm:$0xff] }
 0x299   :  { %v1660_v29 = vmax.f32 %v1656_v41, 0.0  ;;  %v1655_v39 = vadd.f32 %v1645_v23, %v4235_v61  ;;  %v1687_v61 = vpop.permute.xlu0 %1686 }
 0x29b   :  { %v1659_v28 = vmax.f32 %v1655_v39, 0.0  ;;  %2757 = vmatprep.subr.mxu1 %v1660_v29 }
 0x29c   :  { %2758 = vmatpush3.msra.mxu1 %v1660_v29 }
 0x29d   :  { %2759 = vmatprep.subr.mxu1 %v1659_v28  ;;  %v1677_v44 = vpop.permute.xlu0 %1676 }
 0x29e   :  { %2760 = vmatpush3.msra.mxu1 %v1659_v28 }
 0x29f   :  { %2761 = vmatprep.subr.mxu1 %v1658_v38 }
 0x2a0   :  { %2762 = vmatpush3.msra.mxu1 %v1658_v38 }
 0x2a1   :  { %2763 = vmatprep.subr.mxu1 %v1657_v43 }
 0x2a2   :  { %2764 = vmatpush3.msra.mxu1 %v1657_v43 }
 0x2a3   :  { %2766 = vmatmul.mubr.msk.f32.vlgmr.msra.gmra.mxu1 %vm1555_vm14, %v1662_v47  ;;  %2771 = vmatprep.subr.mxu1 %v2876_v12 }
 0x2a4   :  { %2768 = vmatprep.mubr.msk.f32.mxu1 %vm1555_vm14, %v1663_v59 }
 0x2a7   :  { %2769 = vmatmul.mubr.msk.f32.gmra.mxu1 %vm1555_vm14, %v1664_v40 }
 0x2a8   :  { %2779 = vmatprep.mubr.msk.f32.mxu1 %vm2877_vm6, %v2876_v12 }
 0x363   :  { %v2767_v49 = vpop.f32.mrf.mxu1 }
 0x364   :  { %v1773_v53 = vadd.f32 %v2767_v49, %v1677_v44 }
 0x365   :  { %v1767_v36 = vpop.f32.mrf.mxu1 }
 0x366   :  { %v1768_v55 = vadd.f32 %v1767_v36, %v1672_v37  ;;  %v1787_v6 = vadd.f32 %v4237_v62, %v1773_v53  ;;  %v1799_v62 = vpop.permute.xlu0 %1798 }
 0x367   :  { %v2770_v50 = vpop.f32.mrf.mxu1 }
 0x368   :  { %v1783_v52 = vadd.f32 %v2770_v50, %v1687_v61  ;;  %v1786_v46 = vadd.f32 %v1768_v55, %v4239_v0  ;;  %v1791_v35 = vmax.f32 %v1787_v6, 0.0 }
 0x369   :  { %v1777_v45 = vpop.f32.mrf.mxu1 }
 0x36a   :  { %v1789_v56 = vadd.f32 %v4241_v7, %v1783_v52  ;;  %v1778_v57 = vadd.f32 %v1777_v45, %v1682_v48  ;;  %v1790_v3 = vmax.f32 %v1786_v46, 0.0  ;;  %v1794_v7 = vld [vmem:[%s4296_s11] sm:$0x3] }
 0x36c   :  { %v1793_v42 = vmax.f32 %v1789_v56, 0.0  ;;  %v1788_v51 = vadd.f32 %v1778_v57, %v4243_v9 }
 0x36e   :  { %v1792_v11 = vmax.f32 %v1788_v51, 0.0  ;;  %2772 = vmatpush3.msra.mxu1 %v1793_v42 }
 0x36f   :  { %2773 = vmatprep.subr.mxu1 %v2876_v12 }
 0x370   :  { %2774 = vmatpush3.msra.mxu1 %v1792_v11 }
 0x371   :  { %2775 = vmatprep.subr.mxu1 %v2876_v12 }
 0x372   :  { %2776 = vmatpush3.msra.mxu1 %v1791_v35 }
 0x373   :  { %2777 = vmatprep.subr.mxu1 %v2876_v12 }
 0x374   :  { %2778 = vmatpush3.msra.mxu1 %v1790_v3 }
 0x375   :  { %2780 = vmatmul.mubr.msk.f32.vlgmr.msra.gmra.mxu1 %vm1555_vm14, %v1794_v7 }
 0x435   :  { %v1870_v0 = vpop.f32.mrf.mxu1 }
 0x436   :  { %v1871_v9 = vadd.f32 %v1870_v0, %v1799_v62 }
 0x437   :  { %v2781_v4 = vpop.f32.mrf.mxu1 }
 0x438   :  { %1874 = vst [vmem:[#allocation7] sm:$0x3] %v1871_v9 }
 0x439   :  { %2852 = shalt.err (!%p2849_p0)
}
 0x43a   :  { %1884 = dma.vmem_to_hbm [thread:$0]  %s1882_s9, 32, %s4298_s13, [#allocation4]  }
 0x43b   :  { %2865 = dma.done.wait [#allocation4], 32  }
 0x43c   :  { %2866 = vsyncadd [#allocation4], 4294967264 }
 0x43d   :  { %1888 = vsyncpa [#allocation3], 1 }
 0x43e   :  { %1889 = vsyncpa [#allocation6], 1 }
 0x43f   :  { %1890 = vsyncpa [#allocation4], 1 }

</bundles_post_ra>
